<compile_context>
chip_gen: v7x
topology: tpu7x:2x2x1
jax: 0.10.0
libtpu: 0.0.40
codegen_flags: <defaults>
</compile_context>

<pallas_src>
import numpy as np
import jax
import jax.numpy as jnp
from jax.experimental import pallas as pl
from jax.experimental.pallas import tpu as pltpu


# ------------------------------ fused kernel ------------------------------- #
def _fused_kernel(x_ref, s_ref, w1_ref, b1_ref, w2_ref, b2_ref, sel_ref,
                  w3_hbm_ref, b3_ref, w4_ref, b4_ref, o_ref,
                  w3_vmem, dma_sem):
    f32, bf16 = jnp.float32, jnp.bfloat16
    n_tap = s_ref.shape[0]            # 9
    m = x_ref.shape[0]                # B*H*W
    bsz = o_ref.shape[0]              # batch
    n_pos = m // bsz                  # H*W
    c1 = b1_ref.shape[1]              # 128
    c2 = w2_ref.shape[1]              # 64

    # Kick off the big fc1-weight copy first so the HBM->VMEM DMA overlaps
    # the conv1/conv2 compute below.
    w3_copy = pltpu.make_async_copy(w3_hbm_ref, w3_vmem, dma_sem.at[0])
    w3_copy.start()

    x = x_ref[...]                                              # [M, Cin] bf16

    # ---- conv1 (3x3, pad 1) + ReLU: project once, then 9 exact gathers. ----
    y1 = jnp.dot(x, w1_ref[...], preferred_element_type=f32)    # [M, 9*128]
    acc1 = jnp.zeros((m, c1), f32)
    for t in range(n_tap):
        blk = y1[:, t * c1:(t + 1) * c1].astype(bf16)           # 128-aligned slice
        acc1 = acc1 + jnp.dot(s_ref[t], blk, preferred_element_type=f32)
    h1 = jnp.maximum(acc1 + b1_ref[...], 0.0).astype(bf16)      # [M, 128]

    # ---- conv2 (3x3, pad 1) + ReLU: im2col gathers, then ONE projection. ---
    taps = [jnp.dot(s_ref[t], h1, preferred_element_type=f32).astype(bf16)
            for t in range(n_tap)]                              # exact 0/1 gathers
    g2 = jnp.concatenate(taps, axis=1)                          # [M, 9*128] bf16
    acc2 = jnp.dot(g2, w2_ref[...], preferred_element_type=f32)  # [M, 64]
    h2 = jnp.maximum(acc2 + b2_ref[...], 0.0).astype(bf16)      # [M, 64]

    # ---- fc1 + ReLU via Khatri-Rao expansion (torch NCHW flatten folded ----
    # into the pre-permuted w3 / the 0/1 `sel` mask built on the host).
    h2rep = jnp.concatenate([h2] * n_pos, axis=1)               # [M, HW*64] bf16
    h2exp = h2rep * sel_ref[...]                                # keep only own hw-block
    w3_copy.wait()                                              # fc1 weight now in VMEM
    contrib = jnp.dot(h2exp, w3_vmem[...],
                      preferred_element_type=f32)               # [M, 512] f32
    rows = [jnp.sum(contrib[b * n_pos:(b + 1) * n_pos, :], axis=0, keepdims=True)
            for b in range(bsz)]                                # exact f32 batch sums
    h3 = jnp.maximum(jnp.concatenate(rows, axis=0) + b3_ref[...], 0.0)  # [B, 512]

    # ---- fc2 (512 -> 1): VPU multiply + lane reduction. --------------------
    out = jnp.sum(h3 * w4_ref[...], axis=1, keepdims=True) + b4_ref[...]
    o_ref[...] = out.astype(o_ref.dtype)


def _vmem_full(shape):
    """Whole-array block (no grid)."""
    return pl.BlockSpec(shape, lambda *_: (0,) * len(shape))


def fused_forward(pp, x_nchw):
    B, Cin, H, W = x_nchw.shape
    M = B * H * W
    # NCHW -> NHWC-flat rows (b*H*W + h*W + w, ci); tiny (2 KiB) layout op.
    x2d = jnp.transpose(x_nchw, (0, 2, 3, 1)).reshape(M, Cin).astype(jnp.bfloat16)
    dense = (x2d, pp["s"], pp["w1"], pp["b1"], pp["w2"], pp["b2"], pp["sel"])
    tail = (pp["b3"], pp["w4"], pp["b4"])
    in_specs = ([_vmem_full(a.shape) for a in dense]
                + [pl.BlockSpec(memory_space=pl.ANY)]        # fc1 weight stays in HBM
                + [_vmem_full(a.shape) for a in tail])
    return pl.pallas_call(
        _fused_kernel,
        out_shape=jax.ShapeDtypeStruct((B, 1), jnp.float32),
        in_specs=in_specs,
        out_specs=_vmem_full((B, 1)),
        scratch_shapes=[pltpu.VMEM(pp["w3"].shape, pp["w3"].dtype),
                        pltpu.SemaphoreType.DMA((1,))],
        compiler_params=pltpu.CompilerParams(vmem_limit_bytes=32 * 1024 * 1024),
    )(*dense, pp["w3"], *tail)


# --------------------- one-time host-side preprocessing -------------------- #
def make_gather_mats(B, H, W):
    """S[t]: exact 0/1 gather matrix for 3x3 tap t on the [B*H*W] row index."""
    HW = H * W
    M = B * HW
    S = np.zeros((9, M, M), np.float32)
    for t in range(9):
        dy, dx = t // 3 - 1, t % 3 - 1
        for b in range(B):
            for h in range(H):
                for w in range(W):
                    hh, ww = h + dy, w + dx
                    if 0 <= hh < H and 0 <= ww < W:
                        S[t, b * HW + h * W + w, b * HW + hh * W + ww] = 1.0
    return jnp.asarray(S, jnp.bfloat16)


def preprocess_params(params, B, H, W):
    """Rearrange torch-layout weights once (no per-forward transposes)."""
    C1 = params["conv1_w"].shape[0]          # 128
    Cin = params["conv1_w"].shape[1]
    C2 = params["conv2_w"].shape[0]          # 64
    N1 = params["fc1_w"].shape[0]            # 512
    HW = H * W
    S = make_gather_mats(B, H, W)
    # conv1: W1cat[ci, t*C1 + co], tap t = ky*3 + kx (project-then-gather).
    w1 = jnp.transpose(params["conv1_w"], (2, 3, 1, 0)).reshape(9, Cin, C1)
    w1 = jnp.transpose(w1, (1, 0, 2)).reshape(Cin, 9 * C1)
    # conv2: W2stack[t*C1 + ci, co] (im2col gather-then-project).
    w2 = jnp.transpose(params["conv2_w"], (2, 3, 1, 0)).reshape(9 * C1, C2)
    # fc1: [N1, C2*HW] with torch NCHW flatten (k = c*HW + hw)
    #   -> [HW*C2, N1] so rows are hw*C2 + c (matches the Khatri-Rao layout).
    w3 = jnp.transpose(params["fc1_w"].reshape(N1, C2, HW), (2, 1, 0)).reshape(HW * C2, N1)
    # sel[m, hw*C2 + c] = 1 iff (m mod HW) == hw: keeps only the own-position
    # block of the lane-tiled conv2 activations.
    m_hw = np.arange(B * HW) % HW
    k_hw = np.arange(HW * C2) // C2
    sel = (m_hw[:, None] == k_hw[None, :]).astype(np.float32)
    return {
        "s": S,
        "sel": jnp.asarray(sel, jnp.bfloat16),
        "w1": w1.astype(jnp.bfloat16),
        "b1": params["conv1_b"].reshape(1, C1).astype(jnp.float32),
        "w2": w2.astype(jnp.bfloat16),
        "b2": params["conv2_b"].reshape(1, C2).astype(jnp.float32),
        "w3": w3.astype(jnp.bfloat16),
        "b3": params["fc1_b"].reshape(1, N1).astype(jnp.float32),
        "w4": params["fc2_w"].reshape(1, N1).astype(jnp.float32),
        "b4": params["fc2_b"].reshape(1, 1).astype(jnp.float32),
    }


# -------------------------- pure-JAX reference ----------------------------- #
def reference_forward(params, x_nchw):
    dn = ("NCHW", "OIHW", "NCHW")
    y = jax.lax.conv_general_dilated(x_nchw, params["conv1_w"], (1, 1),
                                     ((1, 1), (1, 1)), dimension_numbers=dn)
    y = jnp.maximum(y + params["conv1_b"][None, :, None, None], 0.0)
    y = jax.lax.conv_general_dilated(y, params["conv2_w"], (1, 1),
                                     ((1, 1), (1, 1)), dimension_numbers=dn)
    y = jnp.maximum(y + params["conv2_b"][None, :, None, None], 0.0)
    y = y.reshape(y.shape[0], -1)
    y = jnp.maximum(y @ params["fc1_w"].T + params["fc1_b"], 0.0)
    y = y @ params["fc2_w"].T + params["fc2_b"]
    return y


# ------------------------------- params ------------------------------------ #
def init_params(key, in_channels):
    ks = jax.random.split(key, 8)
    s = 0.05
    return {
        "conv1_w": s * jax.random.normal(ks[0], (128, in_channels, 3, 3), jnp.float32),
        "conv1_b": s * jax.random.normal(ks[1], (128,), jnp.float32),
        "conv2_w": s * jax.random.normal(ks[2], (64, 128, 3, 3), jnp.float32),
        "conv2_b": s * jax.random.normal(ks[3], (64,), jnp.float32),
        "fc1_w":   s * jax.random.normal(ks[4], (512, 64 * in_channels), jnp.float32),
        "fc1_b":   s * jax.random.normal(ks[5], (512,), jnp.float32),
        "fc2_w":   s * jax.random.normal(ks[6], (1, 512), jnp.float32),
        "fc2_b":   s * jax.random.normal(ks[7], (1,), jnp.float32),
    }


if __name__ == "__main__":
    key = jax.random.PRNGKey(0)
    B, Cin, H, W = 2, 16, 4, 4        # module requires H*W == in_channels
    kp, kx = jax.random.split(key)
    params = init_params(kp, Cin)
    x = jax.random.normal(kx, (B, Cin, H, W), jnp.float32)

    pp = preprocess_params(params, B, H, W)     # one-time weight rearrangement
    fwd = jax.jit(fused_forward)

    out = jax.block_until_ready(fwd(pp, x))
    assert out.shape == (B, 1)

    ref = jax.block_until_ready(reference_forward(params, x))
    assert bool(jnp.allclose(out, ref, rtol=5e-2, atol=5e-2)), (out, ref)

    print("KERNEL_OK")
</pallas_src>

<mosaic_0001>
module attributes {stable_mosaic.version = 11 : i64} {
  func.func @_fused_kernel(%arg0: memref<32x16xbf16, #tpu.memory_space<vmem>>, %arg1: memref<9x32x32xbf16, #tpu.memory_space<vmem>>, %arg2: memref<16x1152xbf16, #tpu.memory_space<vmem>>, %arg3: memref<1x128xf32, #tpu.memory_space<vmem>>, %arg4: memref<1152x64xbf16, #tpu.memory_space<vmem>>, %arg5: memref<1x64xf32, #tpu.memory_space<vmem>>, %arg6: memref<32x1024xbf16, #tpu.memory_space<vmem>>, %arg7: memref<1024x512xbf16, #tpu.memory_space<any>>, %arg8: memref<1x512xf32, #tpu.memory_space<vmem>>, %arg9: memref<1x512xf32, #tpu.memory_space<vmem>>, %arg10: memref<1x1xf32, #tpu.memory_space<vmem>>, %arg11: memref<2x1xf32, #tpu.memory_space<vmem>>, %arg12: memref<1024x512xbf16, #tpu.memory_space<vmem>>, %arg13: memref<1x!tpu.dma_semaphore, #tpu.memory_space<semaphore_mem>>) attributes {dimension_semantics = [], scalar_prefetch = 0 : i64, scratch_operands = 2 : i64, tpu.core_type = #tpu.core_type<tc>} {
    %c0_i32 = arith.constant 0 : i32
    %0 = tpu.memref_slice %arg13[%c0_i32] : memref<1x!tpu.dma_semaphore, #tpu.memory_space<semaphore_mem>> -> memref<1x!tpu.dma_semaphore, #tpu.memory_space<semaphore_mem>>
    %1 = tpu.memref_squeeze %0 : memref<1x!tpu.dma_semaphore, #tpu.memory_space<semaphore_mem>> -> memref<!tpu.dma_semaphore, #tpu.memory_space<semaphore_mem>>
    tpu.enqueue_dma source(%arg7 : memref<1024x512xbf16, #tpu.memory_space<any>>) target(%arg12 : memref<1024x512xbf16, #tpu.memory_space<vmem>>) target_semaphore(%1 : memref<!tpu.dma_semaphore, #tpu.memory_space<semaphore_mem>>)
    %c0 = arith.constant 0 : index
    %c0_0 = arith.constant 0 : index
    %2 = vector.load %arg0[%c0, %c0_0] : memref<32x16xbf16, #tpu.memory_space<vmem>>, vector<32x16xbf16>
    %c0_1 = arith.constant 0 : index
    %c0_2 = arith.constant 0 : index
    %3 = vector.load %arg2[%c0_1, %c0_2] : memref<16x1152xbf16, #tpu.memory_space<vmem>>, vector<16x1152xbf16>
    %cst = arith.constant dense<0.000000e+00> : vector<32x1152xf32>
    %4 = tpu.matmul %2, %3, %cst {dimension_numbers = #tpu.dot_dimension_numbers<[1], [0], [0], [1], [0, 0, 1, 1], [], []>} : vector<32x16xbf16>, vector<16x1152xbf16>, vector<32x1152xf32> -> vector<32x1152xf32>
    %cst_3 = arith.constant 0.000000e+00 : f32
    %5 = vector.broadcast %cst_3 : f32 to vector<32x128xf32>
    %6 = vector.extract_strided_slice %4 {offsets = [0, 0], sizes = [32, 128], strides = [1, 1]} : vector<32x1152xf32> to vector<32x128xf32>
    %7 = arith.truncf %6 : vector<32x128xf32> to vector<32x128xbf16>
    %c0_4 = arith.constant 0 : index
    %c0_5 = arith.constant 0 : index
    %c0_6 = arith.constant 0 : index
    %8 = vector.load %arg1[%c0_4, %c0_5, %c0_6] : memref<9x32x32xbf16, #tpu.memory_space<vmem>>, vector<1x32x32xbf16>
    %9 = vector.shape_cast %8 : vector<1x32x32xbf16> to vector<32x32xbf16>
    %cst_7 = arith.constant dense<0.000000e+00> : vector<32x128xf32>
    %10 = tpu.matmul %9, %7, %cst_7 {dimension_numbers = #tpu.dot_dimension_numbers<[1], [0], [0], [1], [0, 0, 1, 1], [], []>} : vector<32x32xbf16>, vector<32x128xbf16>, vector<32x128xf32> -> vector<32x128xf32>
    %11 = arith.addf %5, %10 : vector<32x128xf32>
    %12 = vector.extract_strided_slice %4 {offsets = [0, 128], sizes = [32, 128], strides = [1, 1]} : vector<32x1152xf32> to vector<32x128xf32>
    %13 = arith.truncf %12 : vector<32x128xf32> to vector<32x128xbf16>
    %c1 = arith.constant 1 : index
    %c0_8 = arith.constant 0 : index
    %c0_9 = arith.constant 0 : index
    %14 = vector.load %arg1[%c1, %c0_8, %c0_9] : memref<9x32x32xbf16, #tpu.memory_space<vmem>>, vector<1x32x32xbf16>
    %15 = vector.shape_cast %14 : vector<1x32x32xbf16> to vector<32x32xbf16>
    %cst_10 = arith.constant dense<0.000000e+00> : vector<32x128xf32>
    %16 = tpu.matmul %15, %13, %cst_10 {dimension_numbers = #tpu.dot_dimension_numbers<[1], [0], [0], [1], [0, 0, 1, 1], [], []>} : vector<32x32xbf16>, vector<32x128xbf16>, vector<32x128xf32> -> vector<32x128xf32>
    %17 = arith.addf %11, %16 : vector<32x128xf32>
    %18 = vector.extract_strided_slice %4 {offsets = [0, 256], sizes = [32, 128], strides = [1, 1]} : vector<32x1152xf32> to vector<32x128xf32>
    %19 = arith.truncf %18 : vector<32x128xf32> to vector<32x128xbf16>
    %c2 = arith.constant 2 : index
    %c0_11 = arith.constant 0 : index
    %c0_12 = arith.constant 0 : index
    %20 = vector.load %arg1[%c2, %c0_11, %c0_12] : memref<9x32x32xbf16, #tpu.memory_space<vmem>>, vector<1x32x32xbf16>
    %21 = vector.shape_cast %20 : vector<1x32x32xbf16> to vector<32x32xbf16>
    %cst_13 = arith.constant dense<0.000000e+00> : vector<32x128xf32>
    %22 = tpu.matmul %21, %19, %cst_13 {dimension_numbers = #tpu.dot_dimension_numbers<[1], [0], [0], [1], [0, 0, 1, 1], [], []>} : vector<32x32xbf16>, vector<32x128xbf16>, vector<32x128xf32> -> vector<32x128xf32>
    %23 = arith.addf %17, %22 : vector<32x128xf32>
    %24 = vector.extract_strided_slice %4 {offsets = [0, 384], sizes = [32, 128], strides = [1, 1]} : vector<32x1152xf32> to vector<32x128xf32>
    %25 = arith.truncf %24 : vector<32x128xf32> to vector<32x128xbf16>
    %c3 = arith.constant 3 : index
    %c0_14 = arith.constant 0 : index
    %c0_15 = arith.constant 0 : index
    %26 = vector.load %arg1[%c3, %c0_14, %c0_15] : memref<9x32x32xbf16, #tpu.memory_space<vmem>>, vector<1x32x32xbf16>
    %27 = vector.shape_cast %26 : vector<1x32x32xbf16> to vector<32x32xbf16>
    %cst_16 = arith.constant dense<0.000000e+00> : vector<32x128xf32>
    %28 = tpu.matmul %27, %25, %cst_16 {dimension_numbers = #tpu.dot_dimension_numbers<[1], [0], [0], [1], [0, 0, 1, 1], [], []>} : vector<32x32xbf16>, vector<32x128xbf16>, vector<32x128xf32> -> vector<32x128xf32>
    %29 = arith.addf %23, %28 : vector<32x128xf32>
    %30 = vector.extract_strided_slice %4 {offsets = [0, 512], sizes = [32, 128], strides = [1, 1]} : vector<32x1152xf32> to vector<32x128xf32>
    %31 = arith.truncf %30 : vector<32x128xf32> to vector<32x128xbf16>
    %c4 = arith.constant 4 : index
    %c0_17 = arith.constant 0 : index
    %c0_18 = arith.constant 0 : index
    %32 = vector.load %arg1[%c4, %c0_17, %c0_18] : memref<9x32x32xbf16, #tpu.memory_space<vmem>>, vector<1x32x32xbf16>
    %33 = vector.shape_cast %32 : vector<1x32x32xbf16> to vector<32x32xbf16>
    %cst_19 = arith.constant dense<0.000000e+00> : vector<32x128xf32>
    %34 = tpu.matmul %33, %31, %cst_19 {dimension_numbers = #tpu.dot_dimension_numbers<[1], [0], [0], [1], [0, 0, 1, 1], [], []>} : vector<32x32xbf16>, vector<32x128xbf16>, vector<32x128xf32> -> vector<32x128xf32>
    %35 = arith.addf %29, %34 : vector<32x128xf32>
    %36 = vector.extract_strided_slice %4 {offsets = [0, 640], sizes = [32, 128], strides = [1, 1]} : vector<32x1152xf32> to vector<32x128xf32>
    %37 = arith.truncf %36 : vector<32x128xf32> to vector<32x128xbf16>
    %c5 = arith.constant 5 : index
    %c0_20 = arith.constant 0 : index
    %c0_21 = arith.constant 0 : index
    %38 = vector.load %arg1[%c5, %c0_20, %c0_21] : memref<9x32x32xbf16, #tpu.memory_space<vmem>>, vector<1x32x32xbf16>
    %39 = vector.shape_cast %38 : vector<1x32x32xbf16> to vector<32x32xbf16>
    %cst_22 = arith.constant dense<0.000000e+00> : vector<32x128xf32>
    %40 = tpu.matmul %39, %37, %cst_22 {dimension_numbers = #tpu.dot_dimension_numbers<[1], [0], [0], [1], [0, 0, 1, 1], [], []>} : vector<32x32xbf16>, vector<32x128xbf16>, vector<32x128xf32> -> vector<32x128xf32>
    %41 = arith.addf %35, %40 : vector<32x128xf32>
    %42 = vector.extract_strided_slice %4 {offsets = [0, 768], sizes = [32, 128], strides = [1, 1]} : vector<32x1152xf32> to vector<32x128xf32>
    %43 = arith.truncf %42 : vector<32x128xf32> to vector<32x128xbf16>
    %c6 = arith.constant 6 : index
    %c0_23 = arith.constant 0 : index
    %c0_24 = arith.constant 0 : index
    %44 = vector.load %arg1[%c6, %c0_23, %c0_24] : memref<9x32x32xbf16, #tpu.memory_space<vmem>>, vector<1x32x32xbf16>
    %45 = vector.shape_cast %44 : vector<1x32x32xbf16> to vector<32x32xbf16>
    %cst_25 = arith.constant dense<0.000000e+00> : vector<32x128xf32>
    %46 = tpu.matmul %45, %43, %cst_25 {dimension_numbers = #tpu.dot_dimension_numbers<[1], [0], [0], [1], [0, 0, 1, 1], [], []>} : vector<32x32xbf16>, vector<32x128xbf16>, vector<32x128xf32> -> vector<32x128xf32>
    %47 = arith.addf %41, %46 : vector<32x128xf32>
    %48 = vector.extract_strided_slice %4 {offsets = [0, 896], sizes = [32, 128], strides = [1, 1]} : vector<32x1152xf32> to vector<32x128xf32>
    %49 = arith.truncf %48 : vector<32x128xf32> to vector<32x128xbf16>
    %c7 = arith.constant 7 : index
    %c0_26 = arith.constant 0 : index
    %c0_27 = arith.constant 0 : index
    %50 = vector.load %arg1[%c7, %c0_26, %c0_27] : memref<9x32x32xbf16, #tpu.memory_space<vmem>>, vector<1x32x32xbf16>
    %51 = vector.shape_cast %50 : vector<1x32x32xbf16> to vector<32x32xbf16>
    %cst_28 = arith.constant dense<0.000000e+00> : vector<32x128xf32>
    %52 = tpu.matmul %51, %49, %cst_28 {dimension_numbers = #tpu.dot_dimension_numbers<[1], [0], [0], [1], [0, 0, 1, 1], [], []>} : vector<32x32xbf16>, vector<32x128xbf16>, vector<32x128xf32> -> vector<32x128xf32>
    %53 = arith.addf %47, %52 : vector<32x128xf32>
    %54 = vector.extract_strided_slice %4 {offsets = [0, 1024], sizes = [32, 128], strides = [1, 1]} : vector<32x1152xf32> to vector<32x128xf32>
    %55 = arith.truncf %54 : vector<32x128xf32> to vector<32x128xbf16>
    %c8 = arith.constant 8 : index
    %c0_29 = arith.constant 0 : index
    %c0_30 = arith.constant 0 : index
    %56 = vector.load %arg1[%c8, %c0_29, %c0_30] : memref<9x32x32xbf16, #tpu.memory_space<vmem>>, vector<1x32x32xbf16>
    %57 = vector.shape_cast %56 : vector<1x32x32xbf16> to vector<32x32xbf16>
    %cst_31 = arith.constant dense<0.000000e+00> : vector<32x128xf32>
    %58 = tpu.matmul %57, %55, %cst_31 {dimension_numbers = #tpu.dot_dimension_numbers<[1], [0], [0], [1], [0, 0, 1, 1], [], []>} : vector<32x32xbf16>, vector<32x128xbf16>, vector<32x128xf32> -> vector<32x128xf32>
    %59 = arith.addf %53, %58 : vector<32x128xf32>
    %c0_32 = arith.constant 0 : index
    %c0_33 = arith.constant 0 : index
    %60 = vector.load %arg3[%c0_32, %c0_33] : memref<1x128xf32, #tpu.memory_space<vmem>>, vector<1x128xf32>
    %61 = vector.broadcast %60 : vector<1x128xf32> to vector<32x128xf32>
    %62 = arith.addf %59, %61 : vector<32x128xf32>
    %cst_34 = arith.constant 0.000000e+00 : f32
    %63 = vector.broadcast %cst_34 : f32 to vector<32x128xf32>
    %64 = arith.maximumf %62, %63 : vector<32x128xf32>
    %65 = arith.truncf %64 : vector<32x128xf32> to vector<32x128xbf16>
    %c0_35 = arith.constant 0 : index
    %c0_36 = arith.constant 0 : index
    %c0_37 = arith.constant 0 : index
    %66 = vector.load %arg1[%c0_35, %c0_36, %c0_37] : memref<9x32x32xbf16, #tpu.memory_space<vmem>>, vector<1x32x32xbf16>
    %67 = vector.shape_cast %66 : vector<1x32x32xbf16> to vector<32x32xbf16>
    %cst_38 = arith.constant dense<0.000000e+00> : vector<32x128xf32>
    %68 = tpu.matmul %67, %65, %cst_38 {dimension_numbers = #tpu.dot_dimension_numbers<[1], [0], [0], [1], [0, 0, 1, 1], [], []>} : vector<32x32xbf16>, vector<32x128xbf16>, vector<32x128xf32> -> vector<32x128xf32>
    %69 = arith.truncf %68 : vector<32x128xf32> to vector<32x128xbf16>
    %c1_39 = arith.constant 1 : index
    %c0_40 = arith.constant 0 : index
    %c0_41 = arith.constant 0 : index
    %70 = vector.load %arg1[%c1_39, %c0_40, %c0_41] : memref<9x32x32xbf16, #tpu.memory_space<vmem>>, vector<1x32x32xbf16>
    %71 = vector.shape_cast %70 : vector<1x32x32xbf16> to vector<32x32xbf16>
    %cst_42 = arith.constant dense<0.000000e+00> : vector<32x128xf32>
    %72 = tpu.matmul %71, %65, %cst_42 {dimension_numbers = #tpu.dot_dimension_numbers<[1], [0], [0], [1], [0, 0, 1, 1], [], []>} : vector<32x32xbf16>, vector<32x128xbf16>, vector<32x128xf32> -> vector<32x128xf32>
    %73 = arith.truncf %72 : vector<32x128xf32> to vector<32x128xbf16>
    %c2_43 = arith.constant 2 : index
    %c0_44 = arith.constant 0 : index
    %c0_45 = arith.constant 0 : index
    %74 = vector.load %arg1[%c2_43, %c0_44, %c0_45] : memref<9x32x32xbf16, #tpu.memory_space<vmem>>, vector<1x32x32xbf16>
    %75 = vector.shape_cast %74 : vector<1x32x32xbf16> to vector<32x32xbf16>
    %cst_46 = arith.constant dense<0.000000e+00> : vector<32x128xf32>
    %76 = tpu.matmul %75, %65, %cst_46 {dimension_numbers = #tpu.dot_dimension_numbers<[1], [0], [0], [1], [0, 0, 1, 1], [], []>} : vector<32x32xbf16>, vector<32x128xbf16>, vector<32x128xf32> -> vector<32x128xf32>
    %77 = arith.truncf %76 : vector<32x128xf32> to vector<32x128xbf16>
    %c3_47 = arith.constant 3 : index
    %c0_48 = arith.constant 0 : index
    %c0_49 = arith.constant 0 : index
    %78 = vector.load %arg1[%c3_47, %c0_48, %c0_49] : memref<9x32x32xbf16, #tpu.memory_space<vmem>>, vector<1x32x32xbf16>
    %79 = vector.shape_cast %78 : vector<1x32x32xbf16> to vector<32x32xbf16>
    %cst_50 = arith.constant dense<0.000000e+00> : vector<32x128xf32>
    %80 = tpu.matmul %79, %65, %cst_50 {dimension_numbers = #tpu.dot_dimension_numbers<[1], [0], [0], [1], [0, 0, 1, 1], [], []>} : vector<32x32xbf16>, vector<32x128xbf16>, vector<32x128xf32> -> vector<32x128xf32>
    %81 = arith.truncf %80 : vector<32x128xf32> to vector<32x128xbf16>
    %c4_51 = arith.constant 4 : index
    %c0_52 = arith.constant 0 : index
    %c0_53 = arith.constant 0 : index
    %82 = vector.load %arg1[%c4_51, %c0_52, %c0_53] : memref<9x32x32xbf16, #tpu.memory_space<vmem>>, vector<1x32x32xbf16>
    %83 = vector.shape_cast %82 : vector<1x32x32xbf16> to vector<32x32xbf16>
    %cst_54 = arith.constant dense<0.000000e+00> : vector<32x128xf32>
    %84 = tpu.matmul %83, %65, %cst_54 {dimension_numbers = #tpu.dot_dimension_numbers<[1], [0], [0], [1], [0, 0, 1, 1], [], []>} : vector<32x32xbf16>, vector<32x128xbf16>, vector<32x128xf32> -> vector<32x128xf32>
    %85 = arith.truncf %84 : vector<32x128xf32> to vector<32x128xbf16>
    %c5_55 = arith.constant 5 : index
    %c0_56 = arith.constant 0 : index
    %c0_57 = arith.constant 0 : index
    %86 = vector.load %arg1[%c5_55, %c0_56, %c0_57] : memref<9x32x32xbf16, #tpu.memory_space<vmem>>, vector<1x32x32xbf16>
    %87 = vector.shape_cast %86 : vector<1x32x32xbf16> to vector<32x32xbf16>
    %cst_58 = arith.constant dense<0.000000e+00> : vector<32x128xf32>
    %88 = tpu.matmul %87, %65, %cst_58 {dimension_numbers = #tpu.dot_dimension_numbers<[1], [0], [0], [1], [0, 0, 1, 1], [], []>} : vector<32x32xbf16>, vector<32x128xbf16>, vector<32x128xf32> -> vector<32x128xf32>
    %89 = arith.truncf %88 : vector<32x128xf32> to vector<32x128xbf16>
    %c6_59 = arith.constant 6 : index
    %c0_60 = arith.constant 0 : index
    %c0_61 = arith.constant 0 : index
    %90 = vector.load %arg1[%c6_59, %c0_60, %c0_61] : memref<9x32x32xbf16, #tpu.memory_space<vmem>>, vector<1x32x32xbf16>
    %91 = vector.shape_cast %90 : vector<1x32x32xbf16> to vector<32x32xbf16>
    %cst_62 = arith.constant dense<0.000000e+00> : vector<32x128xf32>
    %92 = tpu.matmul %91, %65, %cst_62 {dimension_numbers = #tpu.dot_dimension_numbers<[1], [0], [0], [1], [0, 0, 1, 1], [], []>} : vector<32x32xbf16>, vector<32x128xbf16>, vector<32x128xf32> -> vector<32x128xf32>
    %93 = arith.truncf %92 : vector<32x128xf32> to vector<32x128xbf16>
    %c7_63 = arith.constant 7 : index
    %c0_64 = arith.constant 0 : index
    %c0_65 = arith.constant 0 : index
    %94 = vector.load %arg1[%c7_63, %c0_64, %c0_65] : memref<9x32x32xbf16, #tpu.memory_space<vmem>>, vector<1x32x32xbf16>
    %95 = vector.shape_cast %94 : vector<1x32x32xbf16> to vector<32x32xbf16>
    %cst_66 = arith.constant dense<0.000000e+00> : vector<32x128xf32>
    %96 = tpu.matmul %95, %65, %cst_66 {dimension_numbers = #tpu.dot_dimension_numbers<[1], [0], [0], [1], [0, 0, 1, 1], [], []>} : vector<32x32xbf16>, vector<32x128xbf16>, vector<32x128xf32> -> vector<32x128xf32>
    %97 = arith.truncf %96 : vector<32x128xf32> to vector<32x128xbf16>
    %c8_67 = arith.constant 8 : index
    %c0_68 = arith.constant 0 : index
    %c0_69 = arith.constant 0 : index
    %98 = vector.load %arg1[%c8_67, %c0_68, %c0_69] : memref<9x32x32xbf16, #tpu.memory_space<vmem>>, vector<1x32x32xbf16>
    %99 = vector.shape_cast %98 : vector<1x32x32xbf16> to vector<32x32xbf16>
    %cst_70 = arith.constant dense<0.000000e+00> : vector<32x128xf32>
    %100 = tpu.matmul %99, %65, %cst_70 {dimension_numbers = #tpu.dot_dimension_numbers<[1], [0], [0], [1], [0, 0, 1, 1], [], []>} : vector<32x32xbf16>, vector<32x128xbf16>, vector<32x128xf32> -> vector<32x128xf32>
    %101 = arith.truncf %100 : vector<32x128xf32> to vector<32x128xbf16>
    %102 = tpu.concatenate %69, %73, %77, %81, %85, %89, %93, %97, %101 in 1 : vector<32x128xbf16>, vector<32x128xbf16>, vector<32x128xbf16>, vector<32x128xbf16>, vector<32x128xbf16>, vector<32x128xbf16>, vector<32x128xbf16>, vector<32x128xbf16>, vector<32x128xbf16> -> vector<32x1152xbf16>
    %c0_71 = arith.constant 0 : index
    %c0_72 = arith.constant 0 : index
    %103 = vector.load %arg4[%c0_71, %c0_72] : memref<1152x64xbf16, #tpu.memory_space<vmem>>, vector<1152x64xbf16>
    %cst_73 = arith.constant dense<0.000000e+00> : vector<32x64xf32>
    %104 = tpu.matmul %102, %103, %cst_73 {dimension_numbers = #tpu.dot_dimension_numbers<[1], [0], [0], [1], [0, 0, 1, 1], [], []>} : vector<32x1152xbf16>, vector<1152x64xbf16>, vector<32x64xf32> -> vector<32x64xf32>
    %c0_74 = arith.constant 0 : index
    %c0_75 = arith.constant 0 : index
    %105 = vector.load %arg5[%c0_74, %c0_75] : memref<1x64xf32, #tpu.memory_space<vmem>>, vector<1x64xf32>
    %106 = vector.broadcast %105 : vector<1x64xf32> to vector<32x64xf32>
    %107 = arith.addf %104, %106 : vector<32x64xf32>
    %cst_76 = arith.constant 0.000000e+00 : f32
    %108 = vector.broadcast %cst_76 : f32 to vector<32x64xf32>
    %109 = arith.maximumf %107, %108 : vector<32x64xf32>
    %110 = arith.truncf %109 : vector<32x64xf32> to vector<32x64xbf16>
    %111 = tpu.concatenate %110, %110, %110, %110, %110, %110, %110, %110, %110, %110, %110, %110, %110, %110, %110, %110 in 1 : vector<32x64xbf16>, vector<32x64xbf16>, vector<32x64xbf16>, vector<32x64xbf16>, vector<32x64xbf16>, vector<32x64xbf16>, vector<32x64xbf16>, vector<32x64xbf16>, vector<32x64xbf16>, vector<32x64xbf16>, vector<32x64xbf16>, vector<32x64xbf16>, vector<32x64xbf16>, vector<32x64xbf16>, vector<32x64xbf16>, vector<32x64xbf16> -> vector<32x1024xbf16>
    %c0_77 = arith.constant 0 : index
    %c0_78 = arith.constant 0 : index
    %112 = vector.load %arg6[%c0_77, %c0_78] : memref<32x1024xbf16, #tpu.memory_space<vmem>>, vector<32x1024xbf16>
    %113 = arith.mulf %111, %112 : vector<32x1024xbf16>
    %c0_i32_79 = arith.constant 0 : i32
    %114 = tpu.memref_slice %arg13[%c0_i32_79] : memref<1x!tpu.dma_semaphore, #tpu.memory_space<semaphore_mem>> -> memref<1x!tpu.dma_semaphore, #tpu.memory_space<semaphore_mem>>
    %115 = tpu.memref_squeeze %114 : memref<1x!tpu.dma_semaphore, #tpu.memory_space<semaphore_mem>> -> memref<!tpu.dma_semaphore, #tpu.memory_space<semaphore_mem>>
    tpu.wait_dma2 semaphore(%115 : memref<!tpu.dma_semaphore, #tpu.memory_space<semaphore_mem>>) src(%arg7 : memref<1024x512xbf16, #tpu.memory_space<any>>) dst(%arg12 : memref<1024x512xbf16, #tpu.memory_space<vmem>>)
    %c0_80 = arith.constant 0 : index
    %c0_81 = arith.constant 0 : index
    %116 = vector.load %arg12[%c0_80, %c0_81] : memref<1024x512xbf16, #tpu.memory_space<vmem>>, vector<1024x512xbf16>
    %cst_82 = arith.constant dense<0.000000e+00> : vector<32x512xf32>
    %117 = tpu.matmul %113, %116, %cst_82 {dimension_numbers = #tpu.dot_dimension_numbers<[1], [0], [0], [1], [0, 0, 1, 1], [], []>} : vector<32x1024xbf16>, vector<1024x512xbf16>, vector<32x512xf32> -> vector<32x512xf32>
    %118 = vector.extract_strided_slice %117 {offsets = [0, 0], sizes = [16, 512], strides = [1, 1]} : vector<32x512xf32> to vector<16x512xf32>
    %cst_83 = arith.constant dense<0.000000e+00> : vector<512xf32>
    %119 = vector.multi_reduction <add>, %118, %cst_83 [0] : vector<16x512xf32> to vector<512xf32>
    %120 = vector.shape_cast %119 : vector<512xf32> to vector<1x512xf32>
    %121 = vector.extract_strided_slice %117 {offsets = [16, 0], sizes = [16, 512], strides = [1, 1]} : vector<32x512xf32> to vector<16x512xf32>
    %cst_84 = arith.constant dense<0.000000e+00> : vector<512xf32>
    %122 = vector.multi_reduction <add>, %121, %cst_84 [0] : vector<16x512xf32> to vector<512xf32>
    %123 = vector.shape_cast %122 : vector<512xf32> to vector<1x512xf32>
    %124 = tpu.concatenate %120, %123 in 0 : vector<1x512xf32>, vector<1x512xf32> -> vector<2x512xf32>
    %c0_85 = arith.constant 0 : index
    %c0_86 = arith.constant 0 : index
    %125 = vector.load %arg8[%c0_85, %c0_86] : memref<1x512xf32, #tpu.memory_space<vmem>>, vector<1x512xf32>
    %126 = vector.broadcast %125 : vector<1x512xf32> to vector<2x512xf32>
    %127 = arith.addf %124, %126 : vector<2x512xf32>
    %cst_87 = arith.constant 0.000000e+00 : f32
    %128 = vector.broadcast %cst_87 : f32 to vector<2x512xf32>
    %129 = arith.maximumf %127, %128 : vector<2x512xf32>
    %c0_88 = arith.constant 0 : index
    %c0_89 = arith.constant 0 : index
    %130 = vector.load %arg9[%c0_88, %c0_89] : memref<1x512xf32, #tpu.memory_space<vmem>>, vector<1x512xf32>
    %131 = vector.broadcast %130 : vector<1x512xf32> to vector<2x512xf32>
    %132 = arith.mulf %129, %131 : vector<2x512xf32>
    %cst_90 = arith.constant dense<0.000000e+00> : vector<2xf32>
    %133 = vector.multi_reduction <add>, %132, %cst_90 [1] : vector<2x512xf32> to vector<2xf32>
    %134 = vector.shape_cast %133 : vector<2xf32> to vector<2x1xf32>
    %c0_91 = arith.constant 0 : index
    %c0_92 = arith.constant 0 : index
    %135 = vector.load %arg10[%c0_91, %c0_92] : memref<1x1xf32, #tpu.memory_space<vmem>>, vector<1x1xf32>
    %136 = vector.broadcast %135 : vector<1x1xf32> to vector<2x1xf32>
    %137 = arith.addf %134, %136 : vector<2x1xf32>
    %c0_93 = arith.constant 0 : index
    %c0_94 = arith.constant 0 : index
    %138 = vector.load %arg11[%c0_93, %c0_94] : memref<2x1xf32, #tpu.memory_space<vmem>>, vector<2x1xf32>
    tpu.vector_store %arg11[%c0_93, %c0_94], %137 {strides = array<i32>} : memref<2x1xf32, #tpu.memory_space<vmem>>, vector<2x1xf32>,
    return
  }
}

</mosaic_0001>

<bundles_post_ra>
// kernel: fused_forward.1
= control target key start
LH: loop header
LB: loop body
LE: loop exit
PB: predicated region body
PF: predicated region fallthrough
CT: control target
= control target key end

     0   :  { %s4772_s0 = inlined_call_operand.vmem [shape: bf16[32,16], index: 0, kind: input, shape index: {}]   ;;  %s4773_s1 = inlined_call_operand.vmem [shape: bf16[9,32,32], index: 1, kind: input, shape index: {}]   ;;  %s4774_s2 = inlined_call_operand.vmem [shape: bf16[16,1152], index: 2, kind: input, shape index: {}]   ;;  %s4775_s3 = inlined_call_operand.vmem [shape: f32[1,128], index: 3, kind: input, shape index: {}]   ;;  %s4776_s4 = inlined_call_operand.vmem [shape: bf16[1152,64], index: 4, kind: input, shape index: {}]   ;;  %s4777_s5 = inlined_call_operand.vmem [shape: f32[1,64], index: 5, kind: input, shape index: {}]   ;;  %s4778_s6 = inlined_call_operand.vmem [shape: bf16[32,1024], index: 6, kind: input, shape index: {}]   ;;  %s4779_s7 = inlined_call_operand.hbm [shape: bf16[1024,512], index: 7, kind: input, shape index: {}]   ;;  %s4780_s8 = inlined_call_operand.vmem [shape: f32[1,512], index: 8, kind: input, shape index: {}]   ;;  %s4781_s9 = inlined_call_operand.vmem [shape: f32[1,512], index: 9, kind: input, shape index: {}]   ;;  %s4782_s10 = inlined_call_operand.<no memory space> [shape: f32[1,1], index: 10, kind: input, shape index: {}]   ;;  %s4783_s11 = inlined_call_operand.vmem [shape: f32[2,1], index: 11, kind: output, shape index: {}]  }
   0x1   :  { %v16_v0 = vstv %s4782_s10 }
   0x2   :  { %17 = vst [vmem:[#allocation4] sm:$0x1] %v16_v0 }
   0x3   :  { %s43_s19 = sld [smem:[#allocation0]]   ;;  %s4121_s20 = smov [#allocation2]   ;;  %v4122_v1 = vmov 0   ;;  %vm144_vm0 = vcmask 130048   ;;  %vm435_vm1 = vcmask 261120   ;;  %vm2404_vm2 = vcmask 523264  }
   0x4   :  { %s51_s21 = sshll.u32 %s4121_s20, 4  ;;  %183 = vmatprep.mubr.bf16.mxu0 %v4122_v1  ;;  %342 = vmatprep.mubr.bf16.mxu1 %v4122_v1  ;;  %s4123_s22 = smov 512   ;;  %s52_s21 = int_to_ptr.vmem [resolvable:$true] %s51_s21 }
   0x5   :  { %55 = sst [smem:[#allocation6]] %s4123_s22  ;;  %s4124_s23 = smov 4  }
   0x6   :  { %57 = sst [smem:[#allocation6 + $0x1]] %s4123_s22  ;;  %s4125_s24 = smov 64  }
   0x7   :  { %59 = sst [smem:[#allocation6 + $0x2]] %s4124_s23  ;;  %s4126_s26 = smov 128  }
   0x8   :  { %61 = sst [smem:[#allocation6 + $0x3]] %s4125_s24  ;;  %s4127_s27 = smov 2  }
   0x9   :  { %s3356_s25 = sshll.u32 %s43_s19, 26  ;;  %63 = sst [smem:[#allocation6 + $0x4]] %s4126_s26 }
   0xa   :  { %s3357_s10 = sadd.s32 134217728, %s3356_s25  ;;  %65 = sst [smem:[#allocation6 + $0x5]] %s4127_s27 }
   0xb   :  { %s4128_s28 = smov 256   ;;  %69 = sst [smem:[#allocation6 + $0x7]] %s4125_s24 }
   0xc   :  { %67 = sst [smem:[#allocation6 + $0x6]] %s4128_s28  ;;  %s4129_s29 = smov [#allocation3]  }
   0xd   :  { %71 = sst [smem:[#allocation6 + $0x8]] %s4124_s23  ;;  %s4130_s30 = smov [#allocation5]  }
   0xe   :  { %73 = dma.general %s4779_s7, 32768, %s52_s21, %s4129_s29, %s4130_s30, [#allocation6], %s3357_s10, 0  }
   0xf   :  { %v4014_v2 = vld [vmem:[%s4774_s2 + $0x4] ss:$36 sps:$4 sm:$0xff]   ;;  %v4021_v6 = vld [vmem:[%s4774_s2 + $0xc] ss:$36 sps:$4 sm:$0xff]   ;;  %v4024_v7 = vld [vmem:[%s4774_s2 + $0x14] ss:$36 sps:$4 sm:$0xff]  }
  0x10   :  { %v4016_v3 = vld [vmem:[%s4774_s2] ss:$36 sps:$4 sm:$0xff]   ;;  %151 = vmatprep.subr.bf16.mxu0 %v4014_v2  ;;  %v4019_v5 = vld [vmem:[%s4774_s2 + $0x8] ss:$36 sps:$4 sm:$0xff]   ;;  %v4027_v9 = vld [vmem:[%s4774_s2 + $0x18] ss:$36 sps:$4 sm:$0xff]  }
  0x11   :  { %v4017_v4 = vld [vmem:[%s4772_s0] sm:$0xff]   ;;  %152 = vmatpush1.bf16.msra.mxu0 %v4016_v3  ;;  %v4018_v10 = vld [vmem:[%s4772_s0 + $0x8] sm:$0xff]   ;;  %v4022_v11 = vld [vmem:[%s4774_s2 + $0x10] ss:$36 sps:$4 sm:$0xff]  }
  0x12   :  { %204 = vmatprep.subr.bf16.mxu0 %v4021_v6  ;;  %v4025_v8 = vld [vmem:[%s4774_s2 + $0x1c] ss:$36 sps:$4 sm:$0xff]   ;;  %v4245_v13 = vld [vmem:[%s4773_s1 + $0x10] sm:$0xff]   ;;  %v4272_v49 = vld [vmem:[%s4773_s1 + $0x8] sm:$0xff]  }
  0x13   :  { %310 = vmatprep.subr.bf16.mxu1 %v4025_v8  ;;  %v4028_v12 = vld [vmem:[%s4774_s2 + $0x20] ss:$36 sps:$4 sm:$0xff]   ;;  %v4260_v33 = vld [vmem:[%s4773_s1 + $0x18] sm:$0xff]   ;;  %v4286_v60 = vld [vmem:[%s4773_s1 + $0x28] sm:$0xff]  }
  0x14   :  { %3369 = vmatmul.mubr.msk.bf16.vlgmr.msra.gmra.mrb[0].mxu0 %vm144_vm0, %v4017_v4  ;;  %311 = vmatpush1.bf16.msra.mxu1 %v4027_v9  ;;  %v4031_v14 = vld [vmem:[%s4773_s1] sm:$0xff]   ;;  %v4291_v61 = vld [vmem:[%s4773_s1 + $0x30] sm:$0xff]   ;;  %v4300_v6 = vld [vmem:[%s4773_s1 + $0x38] sm:$0xff]  }
  0x15   :  { %193 = vmatprep.mubr.bf16.mxu0 %v4122_v1  ;;  %205 = vmatpush1.bf16.msra.mxu0 %v4019_v5  ;;  %v4277_v52 = vld [vmem:[%s4773_s1 + $0x20] sm:$0xff]  }
  0x16   :  { %257 = vmatprep.subr.bf16.mxu0 %v4024_v7  ;;  %v4305_v8 = vld [vmem:[%s4773_s1 + $0x40] sm:$0xff]  }
  0x17   :  { %3375 = vmatmul.mubr.msk.bf16.vlgmr.msra.gmra.mrb[0].mxu1 %vm144_vm0, %v4017_v4 }
  0x18   :  { %352 = vmatprep.mubr.bf16.mxu1 %v4122_v1 }
  0x1c   :  { %3370 = vmatmul.mubr.msk.bf16.gmra.mrb[4].mxu0 %vm144_vm0, %v4018_v10 }
  0x1d   :  { %236 = vmatprep.mubr.bf16.mxu0 %v4122_v1 }
  0x1f   :  { %3376 = vmatmul.mubr.msk.bf16.gmra.mrb[4].mxu1 %vm144_vm0, %v4018_v10 }
  0x20   :  { %3764 = vmatprep.mubr.msk.bf16.mxu1 %vm435_vm1, %v4245_v13 }
  0x24   :  { %3371 = vmatmul.mubr.msk.bf16.vlgmr.msra.gmra.mrb[8].mxu0 %vm144_vm0, %v4017_v4 }
  0x25   :  { %246 = vmatprep.mubr.bf16.mxu0 %v4122_v1  ;;  %258 = vmatpush1.bf16.msra.mxu0 %v4022_v11 }
  0x26   :  { %3754 = vmatprep.subr.bf16.mxu0 %v4028_v12 }
  0x2c   :  { %3372 = vmatmul.mubr.msk.bf16.gmra.mrb[12].mxu0 %vm144_vm0, %v4018_v10 }
  0x2d   :  { %289 = vmatprep.mubr.bf16.mxu0 %v4122_v1 }
  0x34   :  { %3373 = vmatmul.mubr.msk.bf16.vlgmr.msra.gmra.mrb[16].mxu0 %vm144_vm0, %v4017_v4 }
  0x35   :  { %299 = vmatprep.mubr.bf16.mxu0 %v4122_v1  ;;  %3755 = vmatpush3.bf16.msra.mxu0 %v4028_v12  ;;  %v4314_v12 = vld [vmem:[%s4773_s1 + $0x48] sm:$0xff]  }
  0x3c   :  { %3374 = vmatmul.mubr.msk.bf16.gmra.mrb[20].mxu0 %vm144_vm0, %v4018_v10 }
  0x3d   :  { %3756 = vmatprep.mubr.msk.bf16.mxu0 %vm144_vm0, %v4017_v4 }
  0x44   :  { %3757 = vmatmul.mubr.msk.bf16.vlgmr.msra.gmra.mrb[24].mxu0 %vm144_vm0, %v4018_v10 }
  0x45   :  { %3836 = vmatprep.mubr.msk.bf16.mxu0 %vm435_vm1, %v4031_v14 }
  0xe7   :  { %v185_v15 = vpop.f32.mrb[0].mxu0 }
  0xe8   :  { %v187_v16 = vpop.f32.mrb[1].mxu0 }
  0xe9   :  { %v189_v17 = vpop.f32.mrb[2].mxu0 }
  0xea   :  { %v412_v18 = vpack.c.bf16 %v189_v17, %v185_v15  ;;  %v191_v19 = vpop.f32.mrb[3].mxu0  ;;  %v344_v21 = vpop.f32.mrb[0].mxu1  ;;  %v4329_v15 = vld [vmem:[%s4773_s1 + $0x58] sm:$0xff]   ;;  %v4347_v17 = vld [vmem:[%s4773_s1 + $0x68] sm:$0xff]  }
  0xeb   :  { %v418_v20 = vpack.c.bf16 %v191_v19, %v187_v16  ;;  %v346_v22 = vpop.f32.mrb[1].mxu1  ;;  %v4334_v16 = vld [vmem:[%s4773_s1 + $0x60] sm:$0xff]   ;;  %v4364_v19 = vld [vmem:[%s4773_s1 + $0x78] sm:$0xff]  }
  0xec   :  { %v348_v24 = vpop.f32.mrb[2].mxu1 }
  0xed   :  { %3760 = vmatprep.subr.bf16.mxu1 %v418_v20  ;;  %v4253_v26 = vpack.c.bf16 %v348_v24, %v344_v21  ;;  %v350_v27 = vpop.f32.mrb[3].mxu1  ;;  %v4378_v21 = vld [vmem:[%s4773_s1 + $0x88] sm:$0xff]  }
  0xee   :  { %3761 = vmatpush3.bf16.msra.mxu1 %v418_v20  ;;  %v4255_v29 = vpack.c.bf16 %v350_v27, %v346_v22  ;;  %v4369_v20 = vld [vmem:[%s4773_s1 + $0x80] sm:$0xff]   ;;  %v4049_v24 = vld [vmem:[%s4776_s4 + $0x48] sm:$0xff]   ;;  %v4052_v27 = vld [vmem:[%s4776_s4 + $0x10] sm:$0xff]  }
  0xef   :  { %v195_v23 = vpop.f32.mrb[4].mxu0  ;;  %v4047_v22 = vld [vmem:[%s4776_s4 + $0x40] sm:$0xff]  }
  0xf0   :  { %v197_v25 = vpop.f32.mrb[5].mxu0 }
  0xf1   :  { %v199_v28 = vpop.f32.mrb[6].mxu0 }
  0xf2   :  { %v413_v30 = vpack.c.bf16 %v199_v28, %v195_v23  ;;  %v201_v31 = vpop.f32.mrb[7].mxu0  ;;  %v354_v34 = vpop.f32.mrb[4].mxu1  ;;  %v4048_v23 = vld [vmem:[%s4776_s4] sm:$0xff]   ;;  %v4053_v28 = vld [vmem:[%s4776_s4 + $0x58] sm:$0xff]  }
  0xf3   :  { %v419_v32 = vpack.c.bf16 %v201_v31, %v197_v25  ;;  %v356_v35 = vpop.f32.mrb[5].mxu1  ;;  %v4050_v25 = vld [vmem:[%s4776_s4 + $0x8] sm:$0xff]   ;;  %v4056_v31 = vld [vmem:[%s4776_s4 + $0x20] sm:$0xff]  }
  0xf4   :  { %v358_v37 = vpop.f32.mrb[6].mxu1 }
  0xf5   :  { %3762 = vmatprep.subr.bf16.mxu1 %v419_v32  ;;  %v4262_v39 = vpack.c.bf16 %v358_v37, %v354_v34  ;;  %v360_v40 = vpop.f32.mrb[7].mxu1 }
  0xf6   :  { %3763 = vmatpush3.bf16.msra.mxu1 %v419_v32  ;;  %v4266_v42 = vpack.c.bf16 %v360_v40, %v356_v35  ;;  %v3447_v32 = vld [vmem:[%s4775_s3] ss:$0 sm:$0xff] }
  0xf7   :  { %3768 = vmatprep.subr.bf16.mxu1 %v412_v18  ;;  %v238_v36 = vpop.f32.mrb[8].mxu0 }
  0xf8   :  { %v240_v38 = vpop.f32.mrb[9].mxu0 }
  0xf9   :  { %3765 = vmatmul.mubr.msk.bf16.vlgmr.msra.gmra.mrb[8].mxu1 %vm435_vm1, %v4260_v33  ;;  %v242_v41 = vpop.f32.mrb[10].mxu0 }
  0xfa   :  { %3769 = vmatpush3.bf16.msra.mxu1 %v412_v18  ;;  %v556_v43 = vpack.c.bf16 %v242_v41, %v238_v36  ;;  %v244_v44 = vpop.f32.mrb[11].mxu0  ;;  %3772 = vmatprep.mubr.msk.bf16.mxu1 %vm435_vm1, %v4031_v14  ;;  %v4319_v14 = vld [vmem:[%s4773_s1 + $0x50] sm:$0xff]  }
  0xfb   :  { %3770 = vmatprep.subr.bf16.mxu1 %v413_v30  ;;  %v632_v45 = vpack.c.bf16 %v244_v44, %v240_v38  ;;  %v4352_v18 = vld [vmem:[%s4773_s1 + $0x70] sm:$0xff]  }
  0xfe   :  { %3771 = vmatpush3.bf16.msra.mxu1 %v413_v30  ;;  %v4055_v30 = vld [vmem:[%s4776_s4 + $0x60] sm:$0xff]  }
  0xff   :  { %v248_v46 = vpop.f32.mrb[12].mxu0  ;;  %3776 = vmatprep.subr.bf16.mxu1 %v556_v43 }
 0x100   :  { %v250_v47 = vpop.f32.mrb[13].mxu0 }
 0x101   :  { %v252_v48 = vpop.f32.mrb[14].mxu0 }
 0x102   :  { %v557_v50 = vpack.c.bf16 %v252_v48, %v248_v46  ;;  %v254_v51 = vpop.f32.mrb[15].mxu0  ;;  %v4059_v48 = vld [vmem:[%s4776_s4 + $0x68] sm:$0xff]  }
 0x103   :  { %v633_v53 = vpack.c.bf16 %v254_v51, %v250_v47  ;;  %v4062_v51 = vld [vmem:[%s4776_s4 + $0x88] sm:$0xff]  }
 0x105   :  { %3773 = vmatmul.mubr.msk.bf16.vlgmr.msra.gmra.mrb[8].mxu1 %vm435_vm1, %v4272_v49 }
 0x106   :  { %3777 = vmatpush3.bf16.msra.mxu1 %v556_v43  ;;  %3780 = vmatprep.mubr.msk.bf16.mxu1 %vm435_vm1, %v4277_v52 }
 0x107   :  { %3778 = vmatprep.subr.bf16.mxu1 %v557_v50  ;;  %v291_v54 = vpop.f32.mrb[16].mxu0 }
 0x108   :  { %v293_v55 = vpop.f32.mrb[17].mxu0 }
 0x109   :  { %v295_v56 = vpop.f32.mrb[18].mxu0 }
 0x10a   :  { %3779 = vmatpush3.bf16.msra.mxu1 %v557_v50  ;;  %v708_v57 = vpack.c.bf16 %v295_v56, %v291_v54  ;;  %v297_v58 = vpop.f32.mrb[19].mxu0  ;;  %v4061_v50 = vld [vmem:[%s4776_s4 + $0xc8] sm:$0xff]   ;;  %v4065_v54 = vld [vmem:[%s4776_s4 + $0xd0] sm:$0xff]   ;;  %v4067_v56 = vld [vmem:[%s4776_s4 + $0x78] sm:$0xff]  }
 0x10b   :  { %3784 = vmatprep.subr.bf16.mxu1 %v632_v45  ;;  %v784_v59 = vpack.c.bf16 %v297_v58, %v293_v55  ;;  %v4066_v55 = vld [vmem:[%s4776_s4 + $0x90] sm:$0xff]   ;;  %v4069_v58 = vld [vmem:[%s4776_s4 + $0xd8] sm:$0xff]  }
 0x10f   :  { %v301_v62 = vpop.f32.mrb[20].mxu0 }
 0x110   :  { %v303_v63 = vpop.f32.mrb[21].mxu0 }
 0x111   :  { %3781 = vmatmul.mubr.msk.bf16.vlgmr.msra.gmra.mrb[8].mxu1 %vm435_vm1, %v4286_v60  ;;  %v305_v0 = vpop.f32.mrb[22].mxu0 }
 0x112   :  { %3785 = vmatpush3.bf16.msra.mxu1 %v632_v45  ;;  %3788 = vmatprep.mubr.msk.bf16.mxu1 %vm435_vm1, %v4291_v61  ;;  %v709_v1 = vpack.c.bf16 %v305_v0, %v301_v62  ;;  %v307_v2 = vpop.f32.mrb[23].mxu0  ;;  %v4074_v62 = vld [vmem:[%s4776_s4 + $0xa0] sm:$0xff]   ;;  %v4078_v0 = vld [vmem:[%s4776_s4 + $0xa8] sm:$0xff]  }
 0x113   :  { %3786 = vmatprep.subr.bf16.mxu1 %v633_v53  ;;  %v785_v3 = vpack.c.bf16 %v307_v2, %v303_v63  ;;  %v4076_v63 = vld [vmem:[%s4776_s4 + $0xe8] sm:$0xff]   ;;  %v4082_v2 = vld [vmem:[%s4776_s4 + $0xb0] sm:$0xff]  }
 0x116   :  { %3787 = vmatpush3.bf16.msra.mxu1 %v633_v53  ;;  %v4064_v53 = vld [vmem:[%s4776_s4 + $0x30] sm:$0xff]  }
 0x117   :  { %3792 = vmatprep.subr.bf16.mxu1 %v708_v57  ;;  %v3758_v4 = vpop.f32.mrb[24].mxu0 }
 0x118   :  { %v397_v5 = vpop.f32.mrb[25].mxu0 }
 0x119   :  { %v3759_v7 = vpop.f32.mrb[26].mxu0 }
 0x11a   :  { %v1013_v9 = vpack.c.bf16 %v3759_v7, %v3758_v4  ;;  %v400_v10 = vpop.f32.mrb[27].mxu0  ;;  %v4086_v4 = vld [vmem:[%s4776_s4 + $0xb8] sm:$0xff]  }
 0x11b   :  { %v1012_v11 = vpack.c.bf16 %v400_v10, %v397_v5  ;;  %v4089_v5 = vld [vmem:[%s4776_s4 + $0x1c0] sm:$0xff]  }
 0x11d   :  { %3789 = vmatmul.mubr.msk.bf16.vlgmr.msra.gmra.mrb[8].mxu1 %vm435_vm1, %v4300_v6 }
 0x11e   :  { %3793 = vmatpush3.bf16.msra.mxu1 %v708_v57  ;;  %3796 = vmatprep.mubr.msk.bf16.mxu1 %vm435_vm1, %v4305_v8  ;;  %v4068_v57 = vld [vmem:[%s4776_s4 + $0x38] sm:$0xff]  }
 0x11f   :  { %3794 = vmatprep.subr.bf16.mxu1 %v709_v1 }
 0x122   :  { %3795 = vmatpush3.bf16.msra.mxu1 %v709_v1  ;;  %v4080_v1 = vld [vmem:[%s4776_s4 + $0xf0] sm:$0xff]  }
 0x123   :  { %3800 = vmatprep.subr.bf16.mxu1 %v784_v59 }
 0x129   :  { %3797 = vmatmul.mubr.msk.bf16.vlgmr.msra.gmra.mrb[8].mxu1 %vm435_vm1, %v4314_v12 }
 0x12a   :  { %3801 = vmatpush3.bf16.msra.mxu1 %v784_v59  ;;  %3804 = vmatprep.mubr.msk.bf16.mxu1 %vm435_vm1, %v4319_v14  ;;  %v4070_v59 = vld [vmem:[%s4776_s4 + $0x98] sm:$0xff]  }
 0x12b   :  { %3802 = vmatprep.subr.bf16.mxu1 %v785_v3 }
 0x12e   :  { %3803 = vmatpush3.bf16.msra.mxu1 %v785_v3  ;;  %v4084_v3 = vld [vmem:[%s4776_s4 + $0xf8] sm:$0xff]  }
 0x12f   :  { %3808 = vmatprep.subr.bf16.mxu1 %v4253_v26 }
 0x135   :  { %3805 = vmatmul.mubr.msk.bf16.vlgmr.msra.gmra.mrb[8].mxu1 %vm435_vm1, %v4329_v15 }
 0x136   :  { %3809 = vmatpush3.bf16.msra.mxu1 %v4253_v26  ;;  %3812 = vmatprep.mubr.msk.bf16.mxu1 %vm435_vm1, %v4334_v16  ;;  %v4051_v26 = vld [vmem:[%s4776_s4 + $0x50] sm:$0xff]  }
 0x137   :  { %3810 = vmatprep.subr.bf16.mxu1 %v4262_v39 }
 0x13a   :  { %3811 = vmatpush3.bf16.msra.mxu1 %v4262_v39 }
 0x13b   :  { %3816 = vmatprep.subr.bf16.mxu1 %v4255_v29 }
 0x141   :  { %3813 = vmatmul.mubr.msk.bf16.vlgmr.msra.gmra.mrb[8].mxu1 %vm435_vm1, %v4347_v17 }
 0x142   :  { %3817 = vmatpush3.bf16.msra.mxu1 %v4255_v29  ;;  %3820 = vmatprep.mubr.msk.bf16.mxu1 %vm435_vm1, %v4352_v18  ;;  %v4054_v29 = vld [vmem:[%s4776_s4 + $0x18] sm:$0xff]  }
 0x143   :  { %3818 = vmatprep.subr.bf16.mxu1 %v4266_v42 }
 0x146   :  { %3819 = vmatpush3.bf16.msra.mxu1 %v4266_v42 }
 0x147   :  { %3824 = vmatprep.subr.bf16.mxu1 %v1012_v11 }
 0x14d   :  { %3821 = vmatmul.mubr.msk.bf16.vlgmr.msra.gmra.mrb[8].mxu1 %vm435_vm1, %v4364_v19 }
 0x14e   :  { %3825 = vmatpush3.bf16.msra.mxu1 %v1012_v11  ;;  %3828 = vmatprep.mubr.msk.bf16.mxu1 %vm435_vm1, %v4369_v20 }
 0x14f   :  { %3826 = vmatprep.subr.bf16.mxu1 %v1013_v9 }
 0x152   :  { %3827 = vmatpush3.bf16.msra.mxu1 %v1013_v9 }
 0x153   :  { %3632 = vmatprep.subr.bf16.mxu1 %v4047_v22  ;;  %v4077_v22 = vld [vmem:[%s4776_s4 + $0x108] sm:$0xff]  }
 0x159   :  { %3829 = vmatmul.mubr.msk.bf16.vlgmr.msra.gmra.mrb[8].mxu1 %vm435_vm1, %v4378_v21 }
 0x15a   :  { %3633 = vmatpush3.bf16.msra.mxu1 %v4048_v23 }
 0x15b   :  { %3634 = vmatprep.subr.bf16.mxu1 %v4049_v24  ;;  %v4079_v24 = vld [vmem:[%s4776_s4 + $0x150] sm:$0xff]  }
 0x15e   :  { %3635 = vmatpush3.bf16.msra.mxu1 %v4050_v25 }
 0x15f   :  { %3636 = vmatprep.subr.bf16.mxu1 %v4051_v26 }
 0x162   :  { %3637 = vmatpush3.bf16.msra.mxu1 %v4052_v27 }
 0x163   :  { %3638 = vmatprep.subr.bf16.mxu1 %v4053_v28 }
 0x166   :  { %3639 = vmatpush3.bf16.msra.mxu1 %v4054_v29  ;;  %v4081_v29 = vld [vmem:[%s4776_s4 + $0x110] sm:$0xff]  }
 0x167   :  { %3640 = vmatprep.subr.bf16.mxu1 %v4055_v30  ;;  %v4083_v30 = vld [vmem:[%s4776_s4 + $0x158] sm:$0xff]  }
 0x16a   :  { %3641 = vmatpush3.bf16.msra.mxu1 %v4056_v31 }
 0x16b   :  { %3642 = vmatprep.subr.bf16.mxu1 %v4059_v48  ;;  %v4097_v48 = vld [vmem:[%s4776_s4 + $0x1d0] sm:$0xff]  }
 0x22c   :  { %v3830_v34 = vpop.f32.mrb[8].mxu1 }
 0x22d   :  { %v1097_v35 = vadd.f32 %v3830_v34, %v3447_v32  ;;  %v1069_v36 = vpop.f32.mrb[9].mxu1 }
 0x22e   :  { %v1095_v37 = vadd.f32 %v3447_v32, %v1069_v36  ;;  %v3831_v38 = vpop.f32.mrb[10].mxu1 }
 0x22f   :  { %v1098_v39 = vadd.f32 %v3831_v38, %v3447_v32  ;;  %v1072_v40 = vpop.f32.mrb[11].mxu1  ;;  %v1101_v42 = vmax.f32 %v1097_v35, 0.0  ;;  %v4087_v35 = vld [vmem:[%s4776_s4 + $0x160] sm:$0xff]  }
 0x230   :  { %v1096_v41 = vadd.f32 %v3447_v32, %v1072_v40  ;;  %v1099_v44 = vmax.f32 %v1095_v37, 0.0  ;;  %v4085_v32 = vld [vmem:[%s4776_s4 + $0x118] sm:$0xff]   ;;  %v4088_v40 = vld [vmem:[%s4776_s4 + $0x120] sm:$0xff]  }
 0x231   :  { %v1102_v43 = vmax.f32 %v1098_v39, 0.0 }
 0x232   :  { %v1100_v45 = vmax.f32 %v1096_v41, 0.0  ;;  %v4090_v41 = vld [vmem:[%s4776_s4 + $0x180] sm:$0xff]  }
 0x233   :  { %v1104_v46 = vpack.c.bf16 %v1102_v43, %v1101_v42  ;;  %v4091_v42 = vld [vmem:[%s4776_s4 + $0x168] sm:$0xff]  }
 0x234   :  { %v1103_v47 = vpack.c.bf16 %v1100_v45, %v1099_v44  ;;  %v4093_v43 = vld [vmem:[%s4776_s4 + $0x1c8] sm:$0xff]  }
 0x235   :  { %v4092_v45 = vld [vmem:[%s4776_s4 + $0x128] sm:$0xff]  }
 0x236   :  { %3832 = vmatprep.subr.bf16.mxu0 %v1103_v47 }
 0x237   :  { %3833 = vmatpush3.bf16.msra.mxu0 %v1103_v47 }
 0x238   :  { %3834 = vmatprep.subr.bf16.mxu0 %v1104_v46 }
 0x23b   :  { %3835 = vmatpush3.bf16.msra.mxu0 %v1104_v46 }
 0x23c   :  { %3840 = vmatprep.subr.bf16.mxu0 %v1103_v47 }
 0x23e   :  { %3837 = vmatmul.mubr.msk.bf16.vlgmr.msra.gmra.mrb[28].mxu0 %vm435_vm1, %v4272_v49  ;;  %v4060_v49 = vld [vmem:[%s4776_s4 + $0x28] sm:$0xff]  }
 0x23f   :  { %3841 = vmatpush3.bf16.msra.mxu0 %v1103_v47  ;;  %3844 = vmatprep.mubr.msk.bf16.mxu0 %vm435_vm1, %v4245_v13  ;;  %v4057_v13 = vld [vmem:[%s4776_s4 + $0xc0] sm:$0xff]  }
 0x240   :  { %3842 = vmatprep.subr.bf16.mxu0 %v1104_v46  ;;  %3643 = vmatpush3.bf16.msra.mxu1 %v4060_v49 }
 0x243   :  { %3843 = vmatpush3.bf16.msra.mxu0 %v1104_v46 }
 0x244   :  { %3848 = vmatprep.subr.bf16.mxu0 %v1103_v47 }
 0x246   :  { %3845 = vmatmul.mubr.msk.bf16.vlgmr.msra.gmra.mrb[32].mxu0 %vm435_vm1, %v4260_v33  ;;  %v4058_v33 = vld [vmem:[%s4776_s4 + $0x80] sm:$0xff]  }
 0x247   :  { %3849 = vmatpush3.bf16.msra.mxu0 %v1103_v47  ;;  %3852 = vmatprep.mubr.msk.bf16.mxu0 %vm435_vm1, %v4277_v52  ;;  %v4063_v52 = vld [vmem:[%s4776_s4 + $0x70] sm:$0xff]  }
 0x248   :  { %3850 = vmatprep.subr.bf16.mxu0 %v1104_v46  ;;  %3644 = vmatprep.subr.bf16.mxu1 %v4063_v52  ;;  %v4096_v52 = vld [vmem:[%s4776_s4 + $0x130] sm:$0xff]  }
 0x249   :  { %3645 = vmatpush3.bf16.msra.mxu1 %v4064_v53  ;;  %v4098_v53 = vld [vmem:[%s4776_s4 + $0x190] sm:$0xff]  }
 0x24a   :  { %3646 = vmatprep.subr.bf16.mxu1 %v4067_v56 }
 0x24b   :  { %3851 = vmatpush3.bf16.msra.mxu0 %v1104_v46 }
 0x24c   :  { %3856 = vmatprep.subr.bf16.mxu0 %v1103_v47 }
 0x24d   :  { %3647 = vmatpush3.bf16.msra.mxu1 %v4068_v57  ;;  %v4100_v57 = vld [vmem:[%s4776_s4 + $0x138] sm:$0xff]  }
 0x24e   :  { %3853 = vmatmul.mubr.msk.bf16.vlgmr.msra.gmra.mrb[36].mxu0 %vm435_vm1, %v4286_v60  ;;  %v4071_v60 = vld [vmem:[%s4776_s4 + $0x140] sm:$0xff]  }
 0x24f   :  { %3857 = vmatpush3.bf16.msra.mxu0 %v1103_v47  ;;  %3860 = vmatprep.mubr.msk.bf16.mxu0 %vm435_vm1, %v4291_v61  ;;  %v4072_v61 = vld [vmem:[%s4776_s4 + $0xe0] sm:$0xff]  }
 0x250   :  { %3858 = vmatprep.subr.bf16.mxu0 %v1104_v46  ;;  %3688 = vmatprep.subr.bf16.mxu1 %v4071_v60  ;;  %v4103_v60 = vld [vmem:[%s4776_s4 + $0x200] sm:$0xff]  }
 0x253   :  { %3859 = vmatpush3.bf16.msra.mxu0 %v1104_v46 }
 0x254   :  { %3864 = vmatprep.subr.bf16.mxu0 %v1103_v47 }
 0x256   :  { %3861 = vmatmul.mubr.msk.bf16.vlgmr.msra.gmra.mrb[40].mxu0 %vm435_vm1, %v4300_v6 }
 0x257   :  { %3865 = vmatpush3.bf16.msra.mxu0 %v1103_v47  ;;  %3868 = vmatprep.mubr.msk.bf16.mxu0 %vm435_vm1, %v4305_v8 }
 0x258   :  { %3866 = vmatprep.subr.bf16.mxu0 %v1104_v46 }
 0x25b   :  { %3867 = vmatpush3.bf16.msra.mxu0 %v1104_v46 }
 0x25c   :  { %3872 = vmatprep.subr.bf16.mxu0 %v1103_v47 }
 0x25e   :  { %3869 = vmatmul.mubr.msk.bf16.vlgmr.msra.gmra.mrb[44].mxu0 %vm435_vm1, %v4314_v12 }
 0x25f   :  { %3873 = vmatpush3.bf16.msra.mxu0 %v1103_v47  ;;  %3876 = vmatprep.mubr.msk.bf16.mxu0 %vm435_vm1, %v4319_v14 }
 0x260   :  { %3874 = vmatprep.subr.bf16.mxu0 %v1104_v46 }
 0x263   :  { %3875 = vmatpush3.bf16.msra.mxu0 %v1104_v46 }
 0x264   :  { %3880 = vmatprep.subr.bf16.mxu0 %v1103_v47 }
 0x266   :  { %3877 = vmatmul.mubr.msk.bf16.vlgmr.msra.gmra.mrb[48].mxu0 %vm435_vm1, %v4329_v15 }
 0x267   :  { %3881 = vmatpush3.bf16.msra.mxu0 %v1103_v47  ;;  %3884 = vmatprep.mubr.msk.bf16.mxu0 %vm435_vm1, %v4334_v16 }
 0x268   :  { %3882 = vmatprep.subr.bf16.mxu0 %v1104_v46 }
 0x26b   :  { %3883 = vmatpush3.bf16.msra.mxu0 %v1104_v46 }
 0x26c   :  { %3888 = vmatprep.subr.bf16.mxu0 %v1103_v47 }
 0x26e   :  { %3885 = vmatmul.mubr.msk.bf16.vlgmr.msra.gmra.mrb[52].mxu0 %vm435_vm1, %v4347_v17 }
 0x26f   :  { %3889 = vmatpush3.bf16.msra.mxu0 %v1103_v47  ;;  %3892 = vmatprep.mubr.msk.bf16.mxu0 %vm435_vm1, %v4352_v18 }
 0x270   :  { %3890 = vmatprep.subr.bf16.mxu0 %v1104_v46 }
 0x273   :  { %3891 = vmatpush3.bf16.msra.mxu0 %v1104_v46 }
 0x274   :  { %3896 = vmatprep.subr.bf16.mxu0 %v1103_v47 }
 0x276   :  { %3893 = vmatmul.mubr.msk.bf16.vlgmr.msra.gmra.mrb[56].mxu0 %vm435_vm1, %v4364_v19  ;;  %v4073_v19 = vld [vmem:[%s4776_s4 + $0x100] sm:$0xff]  }
 0x277   :  { %3897 = vmatpush3.bf16.msra.mxu0 %v1103_v47  ;;  %3900 = vmatprep.mubr.msk.bf16.mxu0 %vm435_vm1, %v4369_v20  ;;  %v4075_v20 = vld [vmem:[%s4776_s4 + $0x148] sm:$0xff]  }
 0x278   :  { %3898 = vmatprep.subr.bf16.mxu0 %v1104_v46  ;;  %v4094_v47 = vld [vmem:[%s4776_s4 + $0x188] sm:$0xff]  }
 0x27b   :  { %3899 = vmatpush3.bf16.msra.mxu0 %v1104_v46 }
 0x27c   :  { %3660 = vmatprep.subr.bf16.mxu0 %v4057_v13  ;;  %v4095_v13 = vld [vmem:[%s4776_s4 + $0x170] sm:$0xff]  }
 0x27e   :  { %3901 = vmatmul.mubr.msk.bf16.vlgmr.msra.gmra.mrb[60].mxu0 %vm435_vm1, %v4378_v21 }
 0x27f   :  { %3661 = vmatpush3.bf16.msra.mxu0 %v4058_v33 }
 0x280   :  { %3662 = vmatprep.subr.bf16.mxu0 %v4061_v50 }
 0x283   :  { %3663 = vmatpush3.bf16.msra.mxu0 %v4062_v51 }
 0x284   :  { %3664 = vmatprep.subr.bf16.mxu0 %v4065_v54  ;;  %v4099_v54 = vld [vmem:[%s4776_s4 + $0x178] sm:$0xff]  }
 0x287   :  { %3665 = vmatpush3.bf16.msra.mxu0 %v4066_v55  ;;  %v4101_v55 = vld [vmem:[%s4776_s4 + $0x1d8] sm:$0xff]  }
 0x288   :  { %3666 = vmatprep.subr.bf16.mxu0 %v4069_v58 }
 0x28b   :  { %3667 = vmatpush3.bf16.msra.mxu0 %v4070_v59  ;;  %v4102_v59 = vld [vmem:[%s4776_s4 + $0x198] sm:$0xff]  }
 0x28c   :  { %3668 = vmatprep.subr.bf16.mxu0 %v4072_v61 }
 0x28f   :  { %3669 = vmatpush3.bf16.msra.mxu0 %v4074_v62  ;;  %v4104_v62 = vld [vmem:[%s4776_s4 + $0x1e0] sm:$0xff]  }
 0x290   :  { %3670 = vmatprep.subr.bf16.mxu0 %v4076_v63 }
 0x293   :  { %3671 = vmatpush3.bf16.msra.mxu0 %v4078_v0 }
 0x294   :  { %3672 = vmatprep.subr.bf16.mxu0 %v4080_v1 }
 0x297   :  { %3673 = vmatpush3.bf16.msra.mxu0 %v4082_v2  ;;  %v4105_v2 = vld [vmem:[%s4776_s4 + $0x1a0] sm:$0xff]  }
 0x298   :  { %3674 = vmatprep.subr.bf16.mxu0 %v4084_v3  ;;  %v4106_v3 = vld [vmem:[%s4776_s4 + $0x208] sm:$0xff]  }
 0x29b   :  { %3675 = vmatpush3.bf16.msra.mxu0 %v4086_v4  ;;  %v4107_v4 = vld [vmem:[%s4776_s4 + $0x1e8] sm:$0xff]  }
 0x29c   :  { %3716 = vmatprep.subr.bf16.mxu0 %v4089_v5 }
 0x311   :  { %v3838_v6 = vpop.f32.mrb[28].mxu0 }
 0x312   :  { %v1139_v7 = vpop.f32.mrb[29].mxu0 }
 0x313   :  { %v3839_v8 = vpop.f32.mrb[30].mxu0 }
 0x314   :  { %v1155_v9 = vpack.c.bf16 %v3839_v8, %v3838_v6  ;;  %v1142_v10 = vpop.f32.mrb[31].mxu0  ;;  %v4108_v6 = vld [vmem:[%s4776_s4 + $0x1a8] sm:$0xff]   ;;  %v4109_v8 = vld [vmem:[%s4776_s4 + $0x210] sm:$0xff]  }
 0x315   :  { %v1154_v11 = vpack.c.bf16 %v1142_v10, %v1139_v7  ;;  %v4110_v10 = vld [vmem:[%s4776_s4 + $0x1f0] sm:$0xff]  }
 0x319   :  { %v3846_v12 = vpop.f32.mrb[32].mxu0 }
 0x31a   :  { %v1190_v14 = vpop.f32.mrb[33].mxu0 }
 0x31b   :  { %v3847_v15 = vpop.f32.mrb[34].mxu0 }
 0x31c   :  { %v1206_v16 = vpack.c.bf16 %v3847_v15, %v3846_v12  ;;  %v1193_v17 = vpop.f32.mrb[35].mxu0  ;;  %v4111_v15 = vld [vmem:[%s4776_s4 + $0x1b0] sm:$0xff]  }
 0x31d   :  { %v1205_v18 = vpack.c.bf16 %v1193_v17, %v1190_v14  ;;  %v4113_v17 = vld [vmem:[%s4776_s4 + $0x1f8] sm:$0xff]  }
 0x31f   :  { %2179 = vmatprep.mubr.bf16.mxu1 %v1205_v18 }
 0x320   :  { %2180 = vmatmul.mubr.bf16.vlgmr.msra.gmra.mrb[12].mxu1 %v1154_v11 }
 0x321   :  { %3689 = vmatpush3.bf16.msra.mxu1 %v4073_v19  ;;  %2187 = vmatprep.mubr.bf16.mxu1 %v1206_v16  ;;  %v3854_v21 = vpop.f32.mrb[36].mxu0  ;;  %v4112_v16 = vld [vmem:[%s4776_s4 + $0x218] sm:$0xff]  }
 0x322   :  { %3690 = vmatprep.subr.bf16.mxu1 %v4075_v20  ;;  %v1241_v23 = vpop.f32.mrb[37].mxu0  ;;  %v4114_v20 = vld [vmem:[%s4776_s4 + $0x1b8] sm:$0xff]  }
 0x323   :  { %v3855_v25 = vpop.f32.mrb[38].mxu0 }
 0x324   :  { %v1257_v26 = vpack.c.bf16 %v3855_v25, %v3854_v21  ;;  %v1244_v27 = vpop.f32.mrb[39].mxu0  ;;  %v4115_v21 = vld [vmem:[%s4776_s4 + $0x220] sm:$0xff]  }
 0x325   :  { %3691 = vmatpush3.bf16.msra.mxu1 %v4077_v22  ;;  %v1256_v28 = vpack.c.bf16 %v1244_v27, %v1241_v23 }
 0x326   :  { %3692 = vmatprep.subr.bf16.mxu1 %v4079_v24 }
 0x328   :  { %2188 = vmatmul.mubr.bf16.gmra.mrb[16].mxu1 %v1155_v9 }
 0x329   :  { %3693 = vmatpush3.bf16.msra.mxu1 %v4081_v29  ;;  %v3862_v31 = vpop.f32.mrb[40].mxu0 }
 0x32a   :  { %v1292_v34 = vpop.f32.mrb[41].mxu0  ;;  %3694 = vmatprep.subr.bf16.mxu1 %v4083_v30 }
 0x32b   :  { %v3863_v36 = vpop.f32.mrb[42].mxu0 }
 0x32c   :  { %v1308_v37 = vpack.c.bf16 %v3863_v36, %v3862_v31  ;;  %v1295_v38 = vpop.f32.mrb[43].mxu0 }
 0x32d   :  { %v1307_v39 = vpack.c.bf16 %v1295_v38, %v1292_v34  ;;  %3695 = vmatpush3.bf16.msra.mxu1 %v4085_v32 }
 0x32e   :  { %3696 = vmatprep.subr.bf16.mxu1 %v4087_v35  ;;  %v4118_v35 = vld [vmem:[%s4776_s4 + $0x238] sm:$0xff]  }
 0x32f   :  { %2228 = vmatprep.mubr.bf16.mxu0 %v1307_v39 }
 0x330   :  { %2229 = vmatmul.mubr.bf16.vlgmr.msra.gmra.mrb[64].mxu0 %v1256_v28  ;;  %v4117_v28 = vld [vmem:[%s4776_s4 + $0x230] sm:$0xff]  }
 0x331   :  { %3697 = vmatpush3.bf16.msra.mxu1 %v4088_v40  ;;  %2236 = vmatprep.mubr.bf16.mxu0 %v1308_v37  ;;  %v4557_v44 = vpop.f32.mrb[44].mxu0 }
 0x332   :  { %3717 = vmatpush3.bf16.msra.mxu0 %v4090_v41  ;;  %3698 = vmatprep.subr.bf16.mxu1 %v4091_v42  ;;  %v1343_v46 = vpop.f32.mrb[45].mxu0 }
 0x333   :  { %3718 = vmatprep.subr.bf16.mxu0 %v4093_v43  ;;  %v3871_v33 = vpop.f32.mrb[46].mxu0 }
 0x334   :  { %v1359_v49 = vpack.c.bf16 %v3871_v33, %v4557_v44  ;;  %v1346_v50 = vpop.f32.mrb[47].mxu0 }
 0x335   :  { %3699 = vmatpush3.bf16.msra.mxu1 %v4092_v45  ;;  %v1358_v51 = vpack.c.bf16 %v1346_v50, %v1343_v46 }
 0x336   :  { %3719 = vmatpush3.bf16.msra.mxu0 %v4094_v47  ;;  %3700 = vmatprep.subr.bf16.mxu1 %v4095_v13  ;;  %v3466_v13 = vld [vmem:[%s4777_s5] ss:$0 sm:$0xff] }
 0x337   :  { %3720 = vmatprep.subr.bf16.mxu0 %v4097_v48 }
 0x338   :  { %2237 = vmatmul.mubr.bf16.gmra.mrb[68].mxu0 %v1257_v26  ;;  %v4116_v26 = vld [vmem:[%s4776_s4 + $0x228] sm:$0xff]  }
 0x339   :  { %3701 = vmatpush3.bf16.msra.mxu1 %v4096_v52  ;;  %v3878_v56 = vpop.f32.mrb[48].mxu0 }
 0x33a   :  { %3721 = vmatpush3.bf16.msra.mxu0 %v4098_v53  ;;  %v1394_v58 = vpop.f32.mrb[49].mxu0  ;;  %3702 = vmatprep.subr.bf16.mxu1 %v4099_v54 }
 0x33b   :  { %v3879_v61 = vpop.f32.mrb[50].mxu0  ;;  %3722 = vmatprep.subr.bf16.mxu0 %v4101_v55 }
 0x33c   :  { %v1410_v63 = vpack.c.bf16 %v3879_v61, %v3878_v56  ;;  %v1397_v0 = vpop.f32.mrb[51].mxu0 }
 0x33d   :  { %v1409_v1 = vpack.c.bf16 %v1397_v0, %v1394_v58  ;;  %3703 = vmatpush3.bf16.msra.mxu1 %v4100_v57 }
 0x33e   :  { %3723 = vmatpush3.bf16.msra.mxu0 %v4102_v59  ;;  %3904 = vmatprep.subr.bf16.mxu1 %v4103_v60 }
 0x33f   :  { %2277 = vmatprep.mubr.bf16.mxu1 %v1409_v1  ;;  %3724 = vmatprep.subr.bf16.mxu0 %v4104_v62 }
 0x340   :  { %2278 = vmatmul.mubr.bf16.vlgmr.msra.gmra.mrb[20].mxu1 %v1358_v51 }
 0x341   :  { %3905 = vmatpush3.bf16.msra.mxu1 %v4103_v60  ;;  %2285 = vmatprep.mubr.bf16.mxu1 %v1410_v63  ;;  %v3886_v5 = vpop.f32.mrb[52].mxu0 }
 0x342   :  { %3725 = vmatpush3.bf16.msra.mxu0 %v4105_v2  ;;  %3906 = vmatprep.subr.bf16.mxu1 %v4106_v3  ;;  %v1445_v7 = vpop.f32.mrb[53].mxu0 }
 0x343   :  { %3726 = vmatprep.subr.bf16.mxu0 %v4107_v4  ;;  %v3887_v9 = vpop.f32.mrb[54].mxu0 }
 0x344   :  { %v1461_v11 = vpack.c.bf16 %v3887_v9, %v3886_v5  ;;  %v1448_v12 = vpop.f32.mrb[55].mxu0 }
 0x345   :  { %3907 = vmatpush3.bf16.msra.mxu1 %v4106_v3  ;;  %v1460_v14 = vpack.c.bf16 %v1448_v12, %v1445_v7 }
 0x346   :  { %3727 = vmatpush3.bf16.msra.mxu0 %v4108_v6  ;;  %3908 = vmatprep.subr.bf16.mxu1 %v4109_v8 }
 0x347   :  { %3728 = vmatprep.subr.bf16.mxu0 %v4110_v10 }
 0x348   :  { %2286 = vmatmul.mubr.bf16.gmra.mrb[24].mxu1 %v1359_v49 }
 0x349   :  { %3909 = vmatpush3.bf16.msra.mxu1 %v4109_v8  ;;  %v3894_v18 = vpop.f32.mrb[56].mxu0 }
 0x34a   :  { %3729 = vmatpush3.bf16.msra.mxu0 %v4111_v15  ;;  %v1496_v19 = vpop.f32.mrb[57].mxu0  ;;  %3910 = vmatprep.subr.bf16.mxu1 %v4112_v16 }
 0x34b   :  { %v3895_v22 = vpop.f32.mrb[58].mxu0  ;;  %3730 = vmatprep.subr.bf16.mxu0 %v4113_v17 }
 0x34c   :  { %v1512_v23 = vpack.c.bf16 %v3895_v22, %v3894_v18  ;;  %v1499_v24 = vpop.f32.mrb[59].mxu0 }
 0x34d   :  { %v1511_v25 = vpack.c.bf16 %v1499_v24, %v1496_v19  ;;  %3911 = vmatpush3.bf16.msra.mxu1 %v4112_v16 }
 0x34e   :  { %3731 = vmatpush3.bf16.msra.mxu0 %v4114_v20  ;;  %3912 = vmatprep.subr.bf16.mxu1 %v4115_v21 }
 0x34f   :  { %2326 = vmatprep.mubr.bf16.mxu0 %v1511_v25 }
 0x351   :  { %2327 = vmatmul.mubr.bf16.vlgmr.msra.gmra.mrb[72].mxu0 %v1460_v14  ;;  %3913 = vmatpush3.bf16.msra.mxu1 %v4115_v21  ;;  %v3902_v27 = vpop.f32.mrb[60].mxu0 }
 0x352   :  { %3914 = vmatprep.subr.bf16.mxu1 %v4116_v26  ;;  %2334 = vmatprep.mubr.bf16.mxu0 %v1512_v23  ;;  %v1547_v29 = vpop.f32.mrb[61].mxu0 }
 0x353   :  { %v3903_v30 = vpop.f32.mrb[62].mxu0 }
 0x354   :  { %v1563_v31 = vpack.c.bf16 %v3903_v30, %v3902_v27  ;;  %v1550_v32 = vpop.f32.mrb[63].mxu0 }
 0x355   :  { %3915 = vmatpush3.bf16.msra.mxu1 %v4116_v26  ;;  %v1562_v34 = vpack.c.bf16 %v1550_v32, %v1547_v29 }
 0x356   :  { %3916 = vmatprep.subr.bf16.mxu1 %v4117_v28 }
 0x357   :  { %3920 = vmatprep.mubr.bf16.mxu1 %v1562_v34 }
 0x359   :  { %2335 = vmatmul.mubr.bf16.gmra.mrb[76].mxu0 %v1461_v11  ;;  %3917 = vmatpush3.bf16.msra.mxu1 %v4117_v28 }
 0x35a   :  { %3918 = vmatprep.subr.bf16.mxu1 %v4118_v35 }
 0x35d   :  { %3919 = vmatpush3.bf16.msra.mxu1 %v4118_v35 }
 0x360   :  { %3921 = vmatmul.mubr.bf16.vlgmr.msra.gmra.mrb[28].mxu1 %v1563_v31 }
 0x3f3   :  { %v3648_v36 = vpop.f32.mrb[12].mxu1 }
 0x3f4   :  { %v3649_v37 = vpop.f32.mrb[13].mxu1 }
 0x3f5   :  { %v3650_v38 = vadd.f32 %v3649_v37, %v3648_v36  ;;  %v3651_v39 = vpop.f32.mrb[14].mxu1 }
 0x3f6   :  { %v3652_v40 = vpop.f32.mrb[15].mxu1 }
 0x3f7   :  { %v3653_v41 = vadd.f32 %v3652_v40, %v3651_v39  ;;  %v2182_v49 = vadd.f32 %v3650_v38, %v3466_v13 }
 0x3f9   :  { %v2185_v53 = vadd.f32 %v3653_v41, %v3466_v13 }
 0x3fb   :  { %v3654_v42 = vpop.f32.mrb[16].mxu1 }
 0x3fc   :  { %v3655_v43 = vpop.f32.mrb[17].mxu1 }
 0x3fd   :  { %v3656_v44 = vadd.f32 %v3655_v43, %v3654_v42  ;;  %v3657_v45 = vpop.f32.mrb[18].mxu1 }
 0x3fe   :  { %v3658_v46 = vpop.f32.mrb[19].mxu1 }
 0x3ff   :  { %v3659_v47 = vadd.f32 %v3658_v46, %v3657_v45  ;;  %v2190_v59 = vadd.f32 %v3656_v44, %v3466_v13 }
 0x401   :  { %v2193_v63 = vadd.f32 %v3659_v47, %v3466_v13 }
 0x403   :  { %v3676_v33 = vpop.f32.mrb[64].mxu0 }
 0x404   :  { %v3677_v48 = vpop.f32.mrb[65].mxu0 }
 0x405   :  { %v3678_v50 = vadd.f32 %v3677_v48, %v3676_v33  ;;  %v3679_v51 = vpop.f32.mrb[66].mxu0 }
 0x406   :  { %v3680_v52 = vpop.f32.mrb[67].mxu0 }
 0x407   :  { %v2231_v54 = vadd.f32 %v3678_v50, %v2182_v49  ;;  %v3681_v55 = vadd.f32 %v3680_v52, %v3679_v51  ;;  %v2413_v49 = vld [vmem:[%s4778_s6] sm:$0xff]  ;;  %v2414_v50 = vld [vmem:[%s4778_s6 + $0x8] sm:$0xff]  ;;  %v2415_v51 = vld [vmem:[%s4778_s6 + $0x10] sm:$0xff] }
 0x408   :  { %v2416_v52 = vld [vmem:[%s4778_s6 + $0x18] sm:$0xff] }
 0x409   :  { %v2234_v56 = vadd.f32 %v3681_v55, %v2185_v53  ;;  %v2417_v53 = vld [vmem:[%s4778_s6 + $0x20] sm:$0xff]  ;;  %v2419_v55 = vld [vmem:[%s4778_s6 + $0x30] sm:$0xff] }
 0x40b   :  { %v3682_v57 = vpop.f32.mrb[68].mxu0 }
 0x40c   :  { %v3683_v58 = vpop.f32.mrb[69].mxu0 }
 0x40d   :  { %v3684_v60 = vadd.f32 %v3683_v58, %v3682_v57  ;;  %v3685_v61 = vpop.f32.mrb[70].mxu0  ;;  %v2421_v57 = vld [vmem:[%s4778_s6 + $0x40] sm:$0xff]  ;;  %v2422_v58 = vld [vmem:[%s4778_s6 + $0x48] sm:$0xff] }
 0x40e   :  { %v3686_v62 = vpop.f32.mrb[71].mxu0 }
 0x40f   :  { %v2239_v0 = vadd.f32 %v3684_v60, %v2190_v59  ;;  %v3687_v1 = vadd.f32 %v3686_v62, %v3685_v61  ;;  %v2425_v59 = vld [vmem:[%s4778_s6 + $0x60] sm:$0xff]  ;;  %v3539_v60 = vcombine.low %v2413_v49, %v2417_v53  ;;  %v2423_v61 = vld [vmem:[%s4778_s6 + $0x50] sm:$0xff]  ;;  %v2426_v62 = vld [vmem:[%s4778_s6 + $0x68] sm:$0xff] }
 0x411   :  { %v2242_v2 = vadd.f32 %v3687_v1, %v2193_v63  ;;  %v2427_v63 = vld [vmem:[%s4778_s6 + $0x70] sm:$0xff] }
 0x413   :  { %v3704_v3 = vpop.f32.mrb[20].mxu1 }
 0x414   :  { %v3705_v4 = vpop.f32.mrb[21].mxu1 }
 0x415   :  { %v3706_v5 = vadd.f32 %v3705_v4, %v3704_v3  ;;  %v3707_v6 = vpop.f32.mrb[22].mxu1  ;;  %v3543_v3 = vcombine.low %v2415_v51, %v2419_v55  ;;  %v2424_v4 = vld [vmem:[%s4778_s6 + $0x58] sm:$0xff] }
 0x416   :  { %v3708_v7 = vpop.f32.mrb[23].mxu1 }
 0x417   :  { %v2280_v8 = vadd.f32 %v3706_v5, %v2231_v54  ;;  %v3709_v9 = vadd.f32 %v3708_v7, %v3707_v6  ;;  %v2418_v54 = vld [vmem:[%s4778_s6 + $0x28] sm:$0xff]  ;;  %v2428_v5 = vld [vmem:[%s4778_s6 + $0x78] sm:$0xff]  ;;  %v3544_v6 = vcombine.high %v2415_v51, %v2419_v55 }
 0x418   :  { %v3541_v1 = vcombine.low %v2414_v50, %v2418_v54 }
 0x419   :  { %v2283_v10 = vadd.f32 %v3709_v9, %v2234_v56  ;;  %v2420_v56 = vld [vmem:[%s4778_s6 + $0x38] sm:$0xff]  ;;  %v3547_v9 = vcombine.low %v2421_v57, %v2425_v59 }
 0x41a   :  { %v3545_v7 = vcombine.low %v2416_v52, %v2420_v56 }
 0x41b   :  { %v3710_v11 = vpop.f32.mrb[24].mxu1 }
 0x41c   :  { %v3711_v12 = vpop.f32.mrb[25].mxu1 }
 0x41d   :  { %v3712_v14 = vadd.f32 %v3711_v12, %v3710_v11  ;;  %v3713_v15 = vpop.f32.mrb[26].mxu1  ;;  %v3548_v11 = vcombine.high %v2421_v57, %v2425_v59  ;;  %v3549_v12 = vcombine.low %v2422_v58, %v2426_v62 }
 0x41e   :  { %v3714_v16 = vpop.f32.mrb[27].mxu1 }
 0x41f   :  { %v2288_v17 = vadd.f32 %v3712_v14, %v2239_v0  ;;  %v3715_v18 = vadd.f32 %v3714_v16, %v3713_v15  ;;  %v3540_v0 = vcombine.high %v2413_v49, %v2417_v53  ;;  %v3550_v14 = vcombine.high %v2422_v58, %v2426_v62 }
 0x420   :  { %v3551_v15 = vcombine.low %v2423_v61, %v2427_v63 }
 0x421   :  { %v2291_v19 = vadd.f32 %v3715_v18, %v2242_v2  ;;  %v3542_v2 = vcombine.high %v2414_v50, %v2418_v54  ;;  %v3553_v18 = vcombine.low %v2424_v4, %v2428_v5 }
 0x424   :  { %v3732_v20 = vpop.f32.mrb[72].mxu0 }
 0x425   :  { %v3733_v21 = vpop.f32.mrb[73].mxu0 }
 0x426   :  { %v3734_v22 = vadd.f32 %v3733_v21, %v3732_v20  ;;  %v3735_v23 = vpop.f32.mrb[74].mxu0 }
 0x427   :  { %v3736_v24 = vpop.f32.mrb[75].mxu0 }
 0x428   :  { %v3737_v25 = vadd.f32 %v3736_v24, %v3735_v23  ;;  %v2329_v26 = vadd.f32 %v3734_v22, %v2280_v8  ;;  %v3546_v8 = vcombine.high %v2416_v52, %v2420_v56 }
 0x42a   :  { %v2332_v27 = vadd.f32 %v3737_v25, %v2283_v10 }
 0x42c   :  { %v3738_v28 = vpop.f32.mrb[76].mxu0 }
 0x42d   :  { %v3739_v29 = vpop.f32.mrb[77].mxu0 }
 0x42e   :  { %v3740_v30 = vadd.f32 %v3739_v29, %v3738_v28  ;;  %v3741_v31 = vpop.f32.mrb[78].mxu0 }
 0x42f   :  { %v3742_v32 = vpop.f32.mrb[79].mxu0 }
 0x430   :  { %v3743_v34 = vadd.f32 %v3742_v32, %v3741_v31  ;;  %v2337_v35 = vadd.f32 %v3740_v30, %v2288_v17  ;;  %v3552_v17 = vcombine.high %v2423_v61, %v2427_v63 }
 0x432   :  { %v2340_v36 = vadd.f32 %v3743_v34, %v2291_v19  ;;  %v3554_v19 = vcombine.high %v2424_v4, %v2428_v5 }
 0x433   :  { %v3922_v37 = vpop.f32.mrb[28].mxu1 }
 0x434   :  { %v2386_v38 = vadd.f32 %v3922_v37, %v2337_v35  ;;  %v2377_v39 = vpop.f32.mrb[29].mxu1 }
 0x435   :  { %v2378_v40 = vadd.f32 %v2377_v39, %v2329_v26  ;;  %v3923_v41 = vpop.f32.mrb[30].mxu1 }
 0x436   :  { %v2389_v42 = vadd.f32 %v3923_v41, %v2340_v36  ;;  %v2380_v43 = vpop.f32.mrb[31].mxu1  ;;  %v2394_v45 = vmax.f32 %v2386_v38, 0.0 }
 0x437   :  { %v2381_v44 = vadd.f32 %v2380_v43, %v2332_v27  ;;  %v2392_v47 = vmax.f32 %v2378_v40, 0.0 }
 0x438   :  { %v2395_v46 = vmax.f32 %v2389_v42, 0.0 }
 0x439   :  { %v2393_v13 = vmax.f32 %v2381_v44, 0.0 }
 0x43a   :  { %v2397_v33 = vpack.c.bf16 %v2395_v46, %v2394_v45 }
 0x43b   :  { %v2396_v48 = vpack.c.bf16 %v2393_v13, %v2392_v47 }
 0x43d   :  { %2400 = vrot.lane.b32.xlu0 %v2396_v48, %s4125_s24 }
 0x441   :  { %2402 = vrot.lane.b32.xlu0 %v2397_v33, %s4125_s24 }
 0x4af   :  { %v2401_v10 = vpop.permute.xlu0 %2400 }
 0x4b0   :  { %v2407_v16 = vsel %vm2404_vm2, %v2396_v48, %v2401_v10 }
 0x4b1   :  { %v4692_v20 = vmul.bf16 %v3539_v60, %v2407_v16  ;;  %v2510_v21 = vmul.bf16 %v3540_v0, %v2407_v16  ;;  %v4694_v22 = vmul.bf16 %v3541_v1, %v2407_v16  ;;  %v4696_v23 = vmul.bf16 %v3542_v2, %v2407_v16 }
 0x4b2   :  { %v4698_v24 = vmul.bf16 %v3543_v3, %v2407_v16  ;;  %v4700_v25 = vmul.bf16 %v3544_v6, %v2407_v16  ;;  %v4702_v26 = vmul.bf16 %v3545_v7, %v2407_v16  ;;  %v4704_v27 = vmul.bf16 %v3546_v8, %v2407_v16 }
 0x4b3   :  { %v2403_v28 = vpop.permute.xlu0 %2402 }
 0x4b4   :  { %v2411_v29 = vsel %vm2404_vm2, %v2397_v33, %v2403_v28 }
 0x4b5   :  { %v4707_v30 = vmul.bf16 %v3547_v9, %v2411_v29  ;;  %v4709_v31 = vmul.bf16 %v3548_v11, %v2411_v29  ;;  %v4711_v32 = vmul.bf16 %v3549_v12, %v2411_v29  ;;  %v4713_v34 = vmul.bf16 %v3550_v14, %v2411_v29 }
 0x4b6   :  { %v4715_v35 = vmul.bf16 %v3551_v15, %v2411_v29  ;;  %v4717_v36 = vmul.bf16 %v3552_v17, %v2411_v29  ;;  %v4719_v37 = vmul.bf16 %v3553_v18, %v2411_v29  ;;  %v4721_v38 = vmul.bf16 %v3554_v19, %v2411_v29 }
 0x4b7   :  { %4119 = dma.done.wait [#allocation3], 32768 }
 0x4b8   :  { %4120 = vsyncadd [#allocation3], 4294934528  ;;  %2817 = vmatprep.mubr.bf16.mxu0 %v2510_v21  ;;  %3029 = vmatprep.mubr.bf16.mxu1 %v2510_v21  ;;  %v2530_v39 = vld [vmem:[#allocation2 + $0x8] sm:$0xff]  ;;  %v2532_v40 = vld [vmem:[#allocation2 + $0x18] sm:$0xff]  ;;  %vm3265_vm3 = vcmask 1040384   ;;  %vm3326_vm4 = vcmask 1041408  }
 0x4b9   :  { %v2529_v41 = vld [vmem:[#allocation2] sm:$0xff]  ;;  %2785 = vmatprep.subr.bf16.mxu0 %v2530_v39  ;;  %2997 = vmatprep.subr.bf16.mxu1 %v2532_v40  ;;  %v2531_v42 = vld [vmem:[#allocation2 + $0x10] sm:$0xff]  ;;  %v2534_v43 = vld [vmem:[#allocation2 + $0x28] sm:$0xff]  ;;  %vm3344_vm5 = vcmask 1024  }
 0x4ba   :  { %v2536_v44 = vld [vmem:[#allocation2 + $0x38] sm:$0xff]  ;;  %2786 = vmatpush1.bf16.msra.mxu0 %v2529_v41  ;;  %2998 = vmatpush1.bf16.msra.mxu1 %v2531_v42  ;;  %v2533_v45 = vld [vmem:[#allocation2 + $0x20] sm:$0xff]  ;;  %v2535_v46 = vld [vmem:[#allocation2 + $0x30] sm:$0xff] }
 0x4bb   :  { %2787 = vmatprep.subr.bf16.mxu0 %v2534_v43  ;;  %2999 = vmatprep.subr.bf16.mxu1 %v2536_v44  ;;  %v2538_v47 = vld [vmem:[#allocation2 + $0x48] sm:$0xff]  ;;  %v2540_v13 = vld [vmem:[#allocation2 + $0x58] sm:$0xff]  ;;  %v2537_v33 = vld [vmem:[#allocation2 + $0x40] sm:$0xff] }
 0x4bc   :  { %v2539_v48 = vld [vmem:[#allocation2 + $0x50] sm:$0xff]  ;;  %v2542_v49 = vld [vmem:[#allocation2 + $0x68] sm:$0xff]  ;;  %v2544_v50 = vld [vmem:[#allocation2 + $0x78] sm:$0xff] }
 0x4bd   :  { %v2541_v51 = vld [vmem:[#allocation2 + $0x60] sm:$0xff]  ;;  %v2543_v52 = vld [vmem:[#allocation2 + $0x70] sm:$0xff]  ;;  %v2546_v53 = vld [vmem:[#allocation2 + $0x88] sm:$0xff] }
 0x4be   :  { %2788 = vmatpush1.bf16.msra.mxu0 %v2533_v45  ;;  %3000 = vmatpush1.bf16.msra.mxu1 %v2535_v46  ;;  %v2548_v54 = vld [vmem:[#allocation2 + $0x98] sm:$0xff]  ;;  %v2545_v55 = vld [vmem:[#allocation2 + $0x80] sm:$0xff]  ;;  %v2547_v56 = vld [vmem:[#allocation2 + $0x90] sm:$0xff] }
 0x4bf   :  { %2789 = vmatprep.subr.bf16.mxu0 %v2538_v47  ;;  %3001 = vmatprep.subr.bf16.mxu1 %v2540_v13  ;;  %v2550_v57 = vld [vmem:[#allocation2 + $0xa8] sm:$0xff]  ;;  %v2552_v58 = vld [vmem:[#allocation2 + $0xb8] sm:$0xff]  ;;  %v2549_v59 = vld [vmem:[#allocation2 + $0xa0] sm:$0xff] }
 0x4c0   :  { %v2551_v60 = vld [vmem:[#allocation2 + $0xb0] sm:$0xff]  ;;  %v2554_v61 = vld [vmem:[#allocation2 + $0xc8] sm:$0xff]  ;;  %v2556_v62 = vld [vmem:[#allocation2 + $0xd8] sm:$0xff] }
 0x4c1   :  { %v2553_v63 = vld [vmem:[#allocation2 + $0xc0] sm:$0xff]  ;;  %v2555_v0 = vld [vmem:[#allocation2 + $0xd0] sm:$0xff]  ;;  %v2558_v1 = vld [vmem:[#allocation2 + $0xe8] sm:$0xff] }
 0x4c2   :  { %2790 = vmatpush1.bf16.msra.mxu0 %v2537_v33  ;;  %3002 = vmatpush1.bf16.msra.mxu1 %v2539_v48  ;;  %v2560_v2 = vld [vmem:[#allocation2 + $0xf8] sm:$0xff]  ;;  %v2557_v3 = vld [vmem:[#allocation2 + $0xe0] sm:$0xff]  ;;  %v2559_v4 = vld [vmem:[#allocation2 + $0xf0] sm:$0xff] }
 0x4c3   :  { %2791 = vmatprep.subr.bf16.mxu0 %v2542_v49  ;;  %3003 = vmatprep.subr.bf16.mxu1 %v2544_v50  ;;  %v2562_v5 = vld [vmem:[#allocation2 + $0x108] sm:$0xff]  ;;  %v2564_v6 = vld [vmem:[#allocation2 + $0x118] sm:$0xff]  ;;  %v2561_v7 = vld [vmem:[#allocation2 + $0x100] sm:$0xff] }
 0x4c4   :  { %v2563_v8 = vld [vmem:[#allocation2 + $0x110] sm:$0xff]  ;;  %v2566_v9 = vld [vmem:[#allocation2 + $0x128] sm:$0xff]  ;;  %v2568_v10 = vld [vmem:[#allocation2 + $0x138] sm:$0xff] }
 0x4c5   :  { %v2565_v11 = vld [vmem:[#allocation2 + $0x120] sm:$0xff]  ;;  %v2567_v12 = vld [vmem:[#allocation2 + $0x130] sm:$0xff]  ;;  %v2570_v14 = vld [vmem:[#allocation2 + $0x148] sm:$0xff] }
 0x4c6   :  { %2792 = vmatpush1.bf16.msra.mxu0 %v2541_v51  ;;  %3004 = vmatpush1.bf16.msra.mxu1 %v2543_v52  ;;  %v2572_v15 = vld [vmem:[#allocation2 + $0x158] sm:$0xff]  ;;  %v2569_v16 = vld [vmem:[#allocation2 + $0x140] sm:$0xff]  ;;  %v2571_v17 = vld [vmem:[#allocation2 + $0x150] sm:$0xff] }
 0x4c7   :  { %2793 = vmatprep.subr.bf16.mxu0 %v2546_v53  ;;  %3005 = vmatprep.subr.bf16.mxu1 %v2548_v54  ;;  %v2574_v18 = vld [vmem:[#allocation2 + $0x168] sm:$0xff]  ;;  %v2576_v19 = vld [vmem:[#allocation2 + $0x178] sm:$0xff]  ;;  %v2573_v21 = vld [vmem:[#allocation2 + $0x160] sm:$0xff] }
 0x4c8   :  { %v2575_v28 = vld [vmem:[#allocation2 + $0x170] sm:$0xff]  ;;  %v2578_v29 = vld [vmem:[#allocation2 + $0x188] sm:$0xff]  ;;  %v2580_v39 = vld [vmem:[#allocation2 + $0x198] sm:$0xff] }
 0x4c9   :  { %v2577_v40 = vld [vmem:[#allocation2 + $0x180] sm:$0xff]  ;;  %v2579_v41 = vld [vmem:[#allocation2 + $0x190] sm:$0xff]  ;;  %v2582_v42 = vld [vmem:[#allocation2 + $0x1a8] sm:$0xff] }
 0x4ca   :  { %2794 = vmatpush1.bf16.msra.mxu0 %v2545_v55  ;;  %3006 = vmatpush1.bf16.msra.mxu1 %v2547_v56  ;;  %v2584_v43 = vld [vmem:[#allocation2 + $0x1b8] sm:$0xff]  ;;  %v2581_v44 = vld [vmem:[#allocation2 + $0x1a0] sm:$0xff]  ;;  %v2583_v45 = vld [vmem:[#allocation2 + $0x1b0] sm:$0xff] }
 0x4cb   :  { %2795 = vmatprep.subr.bf16.mxu0 %v2550_v57  ;;  %3007 = vmatprep.subr.bf16.mxu1 %v2552_v58  ;;  %v2586_v46 = vld [vmem:[#allocation2 + $0x1c8] sm:$0xff]  ;;  %v2588_v47 = vld [vmem:[#allocation2 + $0x1d8] sm:$0xff]  ;;  %v2585_v13 = vld [vmem:[#allocation2 + $0x1c0] sm:$0xff] }
 0x4cc   :  { %v2587_v33 = vld [vmem:[#allocation2 + $0x1d0] sm:$0xff]  ;;  %v2590_v48 = vld [vmem:[#allocation2 + $0x1e8] sm:$0xff]  ;;  %v2592_v49 = vld [vmem:[#allocation2 + $0x1f8] sm:$0xff] }
 0x4cd   :  { %v2589_v50 = vld [vmem:[#allocation2 + $0x1e0] sm:$0xff]  ;;  %v2591_v51 = vld [vmem:[#allocation2 + $0x1f0] sm:$0xff]  ;;  %v2594_v52 = vld [vmem:[#allocation2 + $0x208] sm:$0xff] }
 0x4ce   :  { %2796 = vmatpush1.bf16.msra.mxu0 %v2549_v59  ;;  %3008 = vmatpush1.bf16.msra.mxu1 %v2551_v60  ;;  %v2596_v53 = vld [vmem:[#allocation2 + $0x218] sm:$0xff]  ;;  %v2593_v54 = vld [vmem:[#allocation2 + $0x200] sm:$0xff]  ;;  %v2595_v55 = vld [vmem:[#allocation2 + $0x210] sm:$0xff] }
 0x4cf   :  { %2797 = vmatprep.subr.bf16.mxu0 %v2554_v61  ;;  %3009 = vmatprep.subr.bf16.mxu1 %v2556_v62  ;;  %v2598_v56 = vld [vmem:[#allocation2 + $0x228] sm:$0xff]  ;;  %v2600_v57 = vld [vmem:[#allocation2 + $0x238] sm:$0xff]  ;;  %v2597_v58 = vld [vmem:[#allocation2 + $0x220] sm:$0xff] }
 0x4d0   :  { %v2599_v59 = vld [vmem:[#allocation2 + $0x230] sm:$0xff]  ;;  %v2602_v60 = vld [vmem:[#allocation2 + $0x248] sm:$0xff]  ;;  %v2604_v61 = vld [vmem:[#allocation2 + $0x258] sm:$0xff] }
 0x4d1   :  { %v2601_v62 = vld [vmem:[#allocation2 + $0x240] sm:$0xff] }
 0x4d2   :  { %2798 = vmatpush1.bf16.msra.mxu0 %v2553_v63  ;;  %3010 = vmatpush1.bf16.msra.mxu1 %v2555_v0  ;;  %v2603_v63 = vld [vmem:[#allocation2 + $0x250] sm:$0xff]  ;;  %v2606_v0 = vld [vmem:[#allocation2 + $0x268] sm:$0xff] }
 0x4d3   :  { %2799 = vmatprep.subr.bf16.mxu0 %v2558_v1  ;;  %3011 = vmatprep.subr.bf16.mxu1 %v2560_v2  ;;  %v2605_v1 = vld [vmem:[#allocation2 + $0x260] sm:$0xff]  ;;  %v2607_v2 = vld [vmem:[#allocation2 + $0x270] sm:$0xff] }
 0x4d6   :  { %2800 = vmatpush1.bf16.msra.mxu0 %v2557_v3  ;;  %3012 = vmatpush1.bf16.msra.mxu1 %v2559_v4  ;;  %v2610_v3 = vld [vmem:[#allocation2 + $0x288] sm:$0xff]  ;;  %v2609_v4 = vld [vmem:[#allocation2 + $0x280] sm:$0xff] }
 0x4d7   :  { %2801 = vmatprep.subr.bf16.mxu0 %v2562_v5  ;;  %3013 = vmatprep.subr.bf16.mxu1 %v2564_v6  ;;  %v2611_v5 = vld [vmem:[#allocation2 + $0x290] sm:$0xff]  ;;  %v2614_v6 = vld [vmem:[#allocation2 + $0x2a8] sm:$0xff] }
 0x4da   :  { %2802 = vmatpush1.bf16.msra.mxu0 %v2561_v7  ;;  %3014 = vmatpush1.bf16.msra.mxu1 %v2563_v8  ;;  %v2613_v7 = vld [vmem:[#allocation2 + $0x2a0] sm:$0xff]  ;;  %v2615_v8 = vld [vmem:[#allocation2 + $0x2b0] sm:$0xff] }
 0x4db   :  { %2803 = vmatprep.subr.bf16.mxu0 %v2566_v9  ;;  %3015 = vmatprep.subr.bf16.mxu1 %v2568_v10  ;;  %v2618_v9 = vld [vmem:[#allocation2 + $0x2c8] sm:$0xff]  ;;  %v2620_v10 = vld [vmem:[#allocation2 + $0x2d8] sm:$0xff] }
 0x4de   :  { %2804 = vmatpush1.bf16.msra.mxu0 %v2565_v11  ;;  %3016 = vmatpush1.bf16.msra.mxu1 %v2567_v12  ;;  %v2619_v11 = vld [vmem:[#allocation2 + $0x2d0] sm:$0xff]  ;;  %v2622_v12 = vld [vmem:[#allocation2 + $0x2e8] sm:$0xff] }
 0x4df   :  { %2805 = vmatprep.subr.bf16.mxu0 %v2570_v14  ;;  %3017 = vmatprep.subr.bf16.mxu1 %v2572_v15  ;;  %v2624_v14 = vld [vmem:[#allocation2 + $0x2f8] sm:$0xff]  ;;  %v2621_v15 = vld [vmem:[#allocation2 + $0x2e0] sm:$0xff] }
 0x4e2   :  { %2806 = vmatpush1.bf16.msra.mxu0 %v2569_v16  ;;  %3018 = vmatpush1.bf16.msra.mxu1 %v2571_v17  ;;  %v2623_v16 = vld [vmem:[#allocation2 + $0x2f0] sm:$0xff]  ;;  %v2626_v17 = vld [vmem:[#allocation2 + $0x308] sm:$0xff] }
 0x4e3   :  { %2807 = vmatprep.subr.bf16.mxu0 %v2574_v18  ;;  %3019 = vmatprep.subr.bf16.mxu1 %v2576_v19  ;;  %v2628_v18 = vld [vmem:[#allocation2 + $0x318] sm:$0xff]  ;;  %v2625_v19 = vld [vmem:[#allocation2 + $0x300] sm:$0xff] }
 0x4e6   :  { %2808 = vmatpush1.bf16.msra.mxu0 %v2573_v21  ;;  %3020 = vmatpush1.bf16.msra.mxu1 %v2575_v28  ;;  %v2627_v21 = vld [vmem:[#allocation2 + $0x310] sm:$0xff]  ;;  %v2630_v28 = vld [vmem:[#allocation2 + $0x328] sm:$0xff] }
 0x4e7   :  { %2809 = vmatprep.subr.bf16.mxu0 %v2578_v29  ;;  %3021 = vmatprep.subr.bf16.mxu1 %v2580_v39  ;;  %v2632_v29 = vld [vmem:[#allocation2 + $0x338] sm:$0xff]  ;;  %v2629_v39 = vld [vmem:[#allocation2 + $0x320] sm:$0xff] }
 0x4ea   :  { %2810 = vmatpush1.bf16.msra.mxu0 %v2577_v40  ;;  %3022 = vmatpush1.bf16.msra.mxu1 %v2579_v41  ;;  %v2631_v40 = vld [vmem:[#allocation2 + $0x330] sm:$0xff]  ;;  %v2634_v41 = vld [vmem:[#allocation2 + $0x348] sm:$0xff] }
 0x4eb   :  { %2811 = vmatprep.subr.bf16.mxu0 %v2582_v42  ;;  %3023 = vmatprep.subr.bf16.mxu1 %v2584_v43  ;;  %v2636_v42 = vld [vmem:[#allocation2 + $0x358] sm:$0xff]  ;;  %v2633_v43 = vld [vmem:[#allocation2 + $0x340] sm:$0xff] }
 0x4ee   :  { %2812 = vmatpush1.bf16.msra.mxu0 %v2581_v44  ;;  %3024 = vmatpush1.bf16.msra.mxu1 %v2583_v45  ;;  %v2635_v44 = vld [vmem:[#allocation2 + $0x350] sm:$0xff]  ;;  %v2638_v45 = vld [vmem:[#allocation2 + $0x368] sm:$0xff] }
 0x4ef   :  { %2813 = vmatprep.subr.bf16.mxu0 %v2586_v46  ;;  %3025 = vmatprep.subr.bf16.mxu1 %v2588_v47  ;;  %v2640_v46 = vld [vmem:[#allocation2 + $0x378] sm:$0xff]  ;;  %v2637_v47 = vld [vmem:[#allocation2 + $0x360] sm:$0xff] }
 0x4f2   :  { %2814 = vmatpush1.bf16.msra.mxu0 %v2585_v13  ;;  %3026 = vmatpush1.bf16.msra.mxu1 %v2587_v33  ;;  %v2639_v13 = vld [vmem:[#allocation2 + $0x370] sm:$0xff]  ;;  %v2642_v33 = vld [vmem:[#allocation2 + $0x388] sm:$0xff] }
 0x4f3   :  { %2815 = vmatprep.subr.bf16.mxu0 %v2590_v48  ;;  %3027 = vmatprep.subr.bf16.mxu1 %v2592_v49  ;;  %v2644_v48 = vld [vmem:[#allocation2 + $0x398] sm:$0xff]  ;;  %v2641_v49 = vld [vmem:[#allocation2 + $0x380] sm:$0xff] }
 0x4f6   :  { %2816 = vmatpush1.bf16.msra.mxu0 %v2589_v50  ;;  %3028 = vmatpush1.bf16.msra.mxu1 %v2591_v51  ;;  %v2643_v50 = vld [vmem:[#allocation2 + $0x390] sm:$0xff]  ;;  %v2646_v51 = vld [vmem:[#allocation2 + $0x3a8] sm:$0xff] }
 0x4f7   :  { %2838 = vmatprep.subr.bf16.mxu0 %v2594_v52  ;;  %3050 = vmatprep.subr.bf16.mxu1 %v2596_v53  ;;  %v2648_v52 = vld [vmem:[#allocation2 + $0x3b8] sm:$0xff]  ;;  %v2645_v53 = vld [vmem:[#allocation2 + $0x3a0] sm:$0xff] }
 0x4f9   :  { %2818 = vmatmul.mubr.bf16.vlgmr.msra.gmra.mrb[80].mxu0 %v4692_v20  ;;  %3030 = vmatmul.mubr.bf16.vlgmr.msra.gmra.mrb[32].mxu1 %v4692_v20  ;;  %v2608_v20 = vld [vmem:[#allocation2 + $0x278] sm:$0xff] }
 0x4fa   :  { %2839 = vmatpush1.bf16.msra.mxu0 %v2593_v54  ;;  %3051 = vmatpush1.bf16.msra.mxu1 %v2595_v55  ;;  %v2647_v54 = vld [vmem:[#allocation2 + $0x3b0] sm:$0xff]  ;;  %v2650_v55 = vld [vmem:[#allocation2 + $0x3c8] sm:$0xff] }
 0x4fb   :  { %2840 = vmatprep.subr.bf16.mxu0 %v2598_v56  ;;  %3052 = vmatprep.subr.bf16.mxu1 %v2600_v57  ;;  %v2652_v56 = vld [vmem:[#allocation2 + $0x3d8] sm:$0xff]  ;;  %v2649_v57 = vld [vmem:[#allocation2 + $0x3c0] sm:$0xff] }
 0x4fc   :  { %2827 = vmatprep.mubr.bf16.mxu0 %v4709_v31  ;;  %3039 = vmatprep.mubr.bf16.mxu1 %v4709_v31  ;;  %v2612_v31 = vld [vmem:[#allocation2 + $0x298] sm:$0xff] }
 0x4fe   :  { %2841 = vmatpush1.bf16.msra.mxu0 %v2597_v58  ;;  %3053 = vmatpush1.bf16.msra.mxu1 %v2599_v59  ;;  %v2651_v58 = vld [vmem:[#allocation2 + $0x3d0] sm:$0xff]  ;;  %v2654_v59 = vld [vmem:[#allocation2 + $0x3e8] sm:$0xff] }
 0x4ff   :  { %2842 = vmatprep.subr.bf16.mxu0 %v2602_v60  ;;  %3054 = vmatprep.subr.bf16.mxu1 %v2604_v61  ;;  %v2656_v60 = vld [vmem:[#allocation2 + $0x3f8] sm:$0xff]  ;;  %v2653_v61 = vld [vmem:[#allocation2 + $0x3e0] sm:$0xff] }
 0x501   :  { %2828 = vmatmul.mubr.bf16.gmra.mrb[84].mxu0 %v4707_v30  ;;  %3040 = vmatmul.mubr.bf16.gmra.mrb[36].mxu1 %v4707_v30  ;;  %v2616_v30 = vld [vmem:[#allocation2 + $0x2b8] sm:$0xff] }
 0x502   :  { %2843 = vmatpush1.bf16.msra.mxu0 %v2601_v62  ;;  %3055 = vmatpush1.bf16.msra.mxu1 %v2603_v63  ;;  %v2655_v62 = vld [vmem:[#allocation2 + $0x3f0] sm:$0xff]  ;;  %v2658_v63 = vld [vmem:[#allocation2 + $0x408] sm:$0xff] }
 0x503   :  { %2844 = vmatprep.subr.bf16.mxu0 %v2606_v0  ;;  %3056 = vmatprep.subr.bf16.mxu1 %v2608_v20  ;;  %v2660_v0 = vld [vmem:[#allocation2 + $0x418] sm:$0xff]  ;;  %v2657_v20 = vld [vmem:[#allocation2 + $0x400] sm:$0xff] }
 0x504   :  { %2870 = vmatprep.mubr.bf16.mxu0 %v4696_v23  ;;  %3082 = vmatprep.mubr.bf16.mxu1 %v4696_v23  ;;  %v2617_v23 = vld [vmem:[#allocation2 + $0x2c0] sm:$0xff] }
 0x506   :  { %2845 = vmatpush1.bf16.msra.mxu0 %v2605_v1  ;;  %3057 = vmatpush1.bf16.msra.mxu1 %v2607_v2  ;;  %v2659_v1 = vld [vmem:[#allocation2 + $0x410] sm:$0xff]  ;;  %v2662_v2 = vld [vmem:[#allocation2 + $0x428] sm:$0xff] }
 0x507   :  { %2846 = vmatprep.subr.bf16.mxu0 %v2610_v3  ;;  %3058 = vmatprep.subr.bf16.mxu1 %v2612_v31  ;;  %v2664_v3 = vld [vmem:[#allocation2 + $0x438] sm:$0xff]  ;;  %v2661_v31 = vld [vmem:[#allocation2 + $0x420] sm:$0xff] }
 0x50a   :  { %2847 = vmatpush1.bf16.msra.mxu0 %v2609_v4  ;;  %3059 = vmatpush1.bf16.msra.mxu1 %v2611_v5  ;;  %v2663_v4 = vld [vmem:[#allocation2 + $0x430] sm:$0xff]  ;;  %v2666_v5 = vld [vmem:[#allocation2 + $0x448] sm:$0xff] }
 0x50b   :  { %2848 = vmatprep.subr.bf16.mxu0 %v2614_v6  ;;  %3060 = vmatprep.subr.bf16.mxu1 %v2616_v30  ;;  %v2668_v6 = vld [vmem:[#allocation2 + $0x458] sm:$0xff]  ;;  %v2665_v30 = vld [vmem:[#allocation2 + $0x440] sm:$0xff] }
 0x50e   :  { %2849 = vmatpush1.bf16.msra.mxu0 %v2613_v7  ;;  %3061 = vmatpush1.bf16.msra.mxu1 %v2615_v8  ;;  %v2667_v7 = vld [vmem:[#allocation2 + $0x450] sm:$0xff]  ;;  %v2670_v8 = vld [vmem:[#allocation2 + $0x468] sm:$0xff] }
 0x50f   :  { %2850 = vmatprep.subr.bf16.mxu0 %v2618_v9  ;;  %3062 = vmatprep.subr.bf16.mxu1 %v2620_v10  ;;  %v2669_v9 = vld [vmem:[#allocation2 + $0x460] sm:$0xff]  ;;  %v2671_v10 = vld [vmem:[#allocation2 + $0x470] sm:$0xff] }
 0x512   :  { %2851 = vmatpush1.bf16.msra.mxu0 %v2617_v23  ;;  %3063 = vmatpush1.bf16.msra.mxu1 %v2619_v11  ;;  %v2674_v23 = vld [vmem:[#allocation2 + $0x488] sm:$0xff]  ;;  %v2673_v11 = vld [vmem:[#allocation2 + $0x480] sm:$0xff] }
 0x513   :  { %2852 = vmatprep.subr.bf16.mxu0 %v2622_v12  ;;  %3064 = vmatprep.subr.bf16.mxu1 %v2624_v14  ;;  %v2675_v12 = vld [vmem:[#allocation2 + $0x490] sm:$0xff]  ;;  %v2678_v14 = vld [vmem:[#allocation2 + $0x4a8] sm:$0xff] }
 0x516   :  { %2853 = vmatpush1.bf16.msra.mxu0 %v2621_v15  ;;  %3065 = vmatpush1.bf16.msra.mxu1 %v2623_v16  ;;  %v2677_v15 = vld [vmem:[#allocation2 + $0x4a0] sm:$0xff]  ;;  %v2679_v16 = vld [vmem:[#allocation2 + $0x4b0] sm:$0xff] }
 0x517   :  { %2854 = vmatprep.subr.bf16.mxu0 %v2626_v17  ;;  %3066 = vmatprep.subr.bf16.mxu1 %v2628_v18  ;;  %v2682_v17 = vld [vmem:[#allocation2 + $0x4c8] sm:$0xff]  ;;  %v2684_v18 = vld [vmem:[#allocation2 + $0x4d8] sm:$0xff] }
 0x51a   :  { %2855 = vmatpush1.bf16.msra.mxu0 %v2625_v19  ;;  %3067 = vmatpush1.bf16.msra.mxu1 %v2627_v21  ;;  %v2683_v19 = vld [vmem:[#allocation2 + $0x4d0] sm:$0xff]  ;;  %v2686_v21 = vld [vmem:[#allocation2 + $0x4e8] sm:$0xff] }
 0x51b   :  { %2856 = vmatprep.subr.bf16.mxu0 %v2630_v28  ;;  %3068 = vmatprep.subr.bf16.mxu1 %v2632_v29  ;;  %v2688_v28 = vld [vmem:[#allocation2 + $0x4f8] sm:$0xff]  ;;  %v2685_v29 = vld [vmem:[#allocation2 + $0x4e0] sm:$0xff] }
 0x51e   :  { %2857 = vmatpush1.bf16.msra.mxu0 %v2629_v39  ;;  %3069 = vmatpush1.bf16.msra.mxu1 %v2631_v40  ;;  %v2687_v39 = vld [vmem:[#allocation2 + $0x4f0] sm:$0xff]  ;;  %v2690_v40 = vld [vmem:[#allocation2 + $0x508] sm:$0xff] }
 0x51f   :  { %2858 = vmatprep.subr.bf16.mxu0 %v2634_v41  ;;  %3070 = vmatprep.subr.bf16.mxu1 %v2636_v42  ;;  %v2692_v41 = vld [vmem:[#allocation2 + $0x518] sm:$0xff]  ;;  %v2689_v42 = vld [vmem:[#allocation2 + $0x500] sm:$0xff] }
 0x522   :  { %2859 = vmatpush1.bf16.msra.mxu0 %v2633_v43  ;;  %3071 = vmatpush1.bf16.msra.mxu1 %v2635_v44  ;;  %v2691_v43 = vld [vmem:[#allocation2 + $0x510] sm:$0xff]  ;;  %v2694_v44 = vld [vmem:[#allocation2 + $0x528] sm:$0xff] }
 0x523   :  { %2860 = vmatprep.subr.bf16.mxu0 %v2638_v45  ;;  %3072 = vmatprep.subr.bf16.mxu1 %v2640_v46  ;;  %v2696_v45 = vld [vmem:[#allocation2 + $0x538] sm:$0xff]  ;;  %v2693_v46 = vld [vmem:[#allocation2 + $0x520] sm:$0xff] }
 0x526   :  { %2861 = vmatpush1.bf16.msra.mxu0 %v2637_v47  ;;  %3073 = vmatpush1.bf16.msra.mxu1 %v2639_v13  ;;  %v2695_v47 = vld [vmem:[#allocation2 + $0x530] sm:$0xff]  ;;  %v2698_v13 = vld [vmem:[#allocation2 + $0x548] sm:$0xff] }
 0x527   :  { %2862 = vmatprep.subr.bf16.mxu0 %v2642_v33  ;;  %3074 = vmatprep.subr.bf16.mxu1 %v2644_v48  ;;  %v2700_v33 = vld [vmem:[#allocation2 + $0x558] sm:$0xff]  ;;  %v2697_v48 = vld [vmem:[#allocation2 + $0x540] sm:$0xff] }
 0x52a   :  { %2863 = vmatpush1.bf16.msra.mxu0 %v2641_v49  ;;  %3075 = vmatpush1.bf16.msra.mxu1 %v2643_v50  ;;  %v2699_v49 = vld [vmem:[#allocation2 + $0x550] sm:$0xff]  ;;  %v2702_v50 = vld [vmem:[#allocation2 + $0x568] sm:$0xff] }
 0x52b   :  { %2864 = vmatprep.subr.bf16.mxu0 %v2646_v51  ;;  %3076 = vmatprep.subr.bf16.mxu1 %v2648_v52  ;;  %v2704_v51 = vld [vmem:[#allocation2 + $0x578] sm:$0xff]  ;;  %v2701_v52 = vld [vmem:[#allocation2 + $0x560] sm:$0xff] }
 0x52e   :  { %2865 = vmatpush1.bf16.msra.mxu0 %v2645_v53  ;;  %3077 = vmatpush1.bf16.msra.mxu1 %v2647_v54  ;;  %v2703_v53 = vld [vmem:[#allocation2 + $0x570] sm:$0xff]  ;;  %v2706_v54 = vld [vmem:[#allocation2 + $0x588] sm:$0xff] }
 0x52f   :  { %2866 = vmatprep.subr.bf16.mxu0 %v2650_v55  ;;  %3078 = vmatprep.subr.bf16.mxu1 %v2652_v56  ;;  %v2708_v55 = vld [vmem:[#allocation2 + $0x598] sm:$0xff]  ;;  %v2705_v56 = vld [vmem:[#allocation2 + $0x580] sm:$0xff] }
 0x532   :  { %2867 = vmatpush1.bf16.msra.mxu0 %v2649_v57  ;;  %3079 = vmatpush1.bf16.msra.mxu1 %v2651_v58  ;;  %v2707_v57 = vld [vmem:[#allocation2 + $0x590] sm:$0xff]  ;;  %v2710_v58 = vld [vmem:[#allocation2 + $0x5a8] sm:$0xff] }
 0x533   :  { %2868 = vmatprep.subr.bf16.mxu0 %v2654_v59  ;;  %3080 = vmatprep.subr.bf16.mxu1 %v2656_v60  ;;  %v2712_v59 = vld [vmem:[#allocation2 + $0x5b8] sm:$0xff]  ;;  %v2709_v60 = vld [vmem:[#allocation2 + $0x5a0] sm:$0xff] }
 0x536   :  { %2869 = vmatpush1.bf16.msra.mxu0 %v2653_v61  ;;  %3081 = vmatpush1.bf16.msra.mxu1 %v2655_v62  ;;  %v2711_v61 = vld [vmem:[#allocation2 + $0x5b0] sm:$0xff]  ;;  %v2714_v62 = vld [vmem:[#allocation2 + $0x5c8] sm:$0xff] }
 0x537   :  { %2891 = vmatprep.subr.bf16.mxu0 %v2658_v63  ;;  %3103 = vmatprep.subr.bf16.mxu1 %v2660_v0  ;;  %v2716_v63 = vld [vmem:[#allocation2 + $0x5d8] sm:$0xff]  ;;  %v2713_v0 = vld [vmem:[#allocation2 + $0x5c0] sm:$0xff] }
 0x539   :  { %2871 = vmatmul.mubr.bf16.vlgmr.msra.gmra.mrb[80].mxu0 %v4694_v22  ;;  %3083 = vmatmul.mubr.bf16.vlgmr.msra.gmra.mrb[32].mxu1 %v4694_v22  ;;  %v2672_v22 = vld [vmem:[#allocation2 + $0x478] sm:$0xff] }
 0x53a   :  { %2892 = vmatpush1.bf16.msra.mxu0 %v2657_v20  ;;  %3104 = vmatpush1.bf16.msra.mxu1 %v2659_v1  ;;  %v2715_v20 = vld [vmem:[#allocation2 + $0x5d0] sm:$0xff]  ;;  %v2718_v1 = vld [vmem:[#allocation2 + $0x5e8] sm:$0xff] }
 0x53b   :  { %2893 = vmatprep.subr.bf16.mxu0 %v2662_v2  ;;  %3105 = vmatprep.subr.bf16.mxu1 %v2664_v3  ;;  %v2720_v2 = vld [vmem:[#allocation2 + $0x5f8] sm:$0xff]  ;;  %v2717_v3 = vld [vmem:[#allocation2 + $0x5e0] sm:$0xff] }
 0x53c   :  { %2880 = vmatprep.mubr.bf16.mxu0 %v4713_v34  ;;  %3092 = vmatprep.mubr.bf16.mxu1 %v4713_v34  ;;  %v2676_v34 = vld [vmem:[#allocation2 + $0x498] sm:$0xff] }
 0x53e   :  { %2894 = vmatpush1.bf16.msra.mxu0 %v2661_v31  ;;  %3106 = vmatpush1.bf16.msra.mxu1 %v2663_v4  ;;  %v2719_v31 = vld [vmem:[#allocation2 + $0x5f0] sm:$0xff]  ;;  %v2722_v4 = vld [vmem:[#allocation2 + $0x608] sm:$0xff] }
 0x53f   :  { %2895 = vmatprep.subr.bf16.mxu0 %v2666_v5  ;;  %3107 = vmatprep.subr.bf16.mxu1 %v2668_v6  ;;  %v2724_v5 = vld [vmem:[#allocation2 + $0x618] sm:$0xff]  ;;  %v2721_v6 = vld [vmem:[#allocation2 + $0x600] sm:$0xff] }
 0x541   :  { %2881 = vmatmul.mubr.bf16.gmra.mrb[84].mxu0 %v4711_v32  ;;  %3093 = vmatmul.mubr.bf16.gmra.mrb[36].mxu1 %v4711_v32  ;;  %v2680_v32 = vld [vmem:[#allocation2 + $0x4b8] sm:$0xff] }
 0x542   :  { %2896 = vmatpush1.bf16.msra.mxu0 %v2665_v30  ;;  %3108 = vmatpush1.bf16.msra.mxu1 %v2667_v7  ;;  %v2723_v30 = vld [vmem:[#allocation2 + $0x610] sm:$0xff]  ;;  %v2726_v7 = vld [vmem:[#allocation2 + $0x628] sm:$0xff] }
 0x543   :  { %2897 = vmatprep.subr.bf16.mxu0 %v2670_v8  ;;  %3109 = vmatprep.subr.bf16.mxu1 %v2672_v22  ;;  %v2728_v8 = vld [vmem:[#allocation2 + $0x638] sm:$0xff]  ;;  %v2725_v22 = vld [vmem:[#allocation2 + $0x620] sm:$0xff] }
 0x544   :  { %2923 = vmatprep.mubr.bf16.mxu0 %v4700_v25  ;;  %3135 = vmatprep.mubr.bf16.mxu1 %v4700_v25  ;;  %v2681_v25 = vld [vmem:[#allocation2 + $0x4c0] sm:$0xff] }
 0x546   :  { %2898 = vmatpush1.bf16.msra.mxu0 %v2669_v9  ;;  %3110 = vmatpush1.bf16.msra.mxu1 %v2671_v10  ;;  %v2727_v9 = vld [vmem:[#allocation2 + $0x630] sm:$0xff]  ;;  %v2730_v10 = vld [vmem:[#allocation2 + $0x648] sm:$0xff] }
 0x547   :  { %2899 = vmatprep.subr.bf16.mxu0 %v2674_v23  ;;  %3111 = vmatprep.subr.bf16.mxu1 %v2676_v34  ;;  %v2732_v23 = vld [vmem:[#allocation2 + $0x658] sm:$0xff]  ;;  %v2729_v34 = vld [vmem:[#allocation2 + $0x640] sm:$0xff] }
 0x54a   :  { %2900 = vmatpush1.bf16.msra.mxu0 %v2673_v11  ;;  %3112 = vmatpush1.bf16.msra.mxu1 %v2675_v12  ;;  %v2731_v11 = vld [vmem:[#allocation2 + $0x650] sm:$0xff]  ;;  %v2734_v12 = vld [vmem:[#allocation2 + $0x668] sm:$0xff] }
 0x54b   :  { %2901 = vmatprep.subr.bf16.mxu0 %v2678_v14  ;;  %3113 = vmatprep.subr.bf16.mxu1 %v2680_v32  ;;  %v2733_v14 = vld [vmem:[#allocation2 + $0x660] sm:$0xff]  ;;  %v2735_v32 = vld [vmem:[#allocation2 + $0x670] sm:$0xff] }
 0x54e   :  { %2902 = vmatpush1.bf16.msra.mxu0 %v2677_v15  ;;  %3114 = vmatpush1.bf16.msra.mxu1 %v2679_v16  ;;  %v2738_v15 = vld [vmem:[#allocation2 + $0x688] sm:$0xff]  ;;  %v2737_v16 = vld [vmem:[#allocation2 + $0x680] sm:$0xff] }
 0x54f   :  { %2903 = vmatprep.subr.bf16.mxu0 %v2682_v17  ;;  %3115 = vmatprep.subr.bf16.mxu1 %v2684_v18  ;;  %v2739_v17 = vld [vmem:[#allocation2 + $0x690] sm:$0xff]  ;;  %v2742_v18 = vld [vmem:[#allocation2 + $0x6a8] sm:$0xff] }
 0x552   :  { %2904 = vmatpush1.bf16.msra.mxu0 %v2681_v25  ;;  %3116 = vmatpush1.bf16.msra.mxu1 %v2683_v19  ;;  %v2741_v25 = vld [vmem:[#allocation2 + $0x6a0] sm:$0xff]  ;;  %v2743_v19 = vld [vmem:[#allocation2 + $0x6b0] sm:$0xff] }
 0x553   :  { %2905 = vmatprep.subr.bf16.mxu0 %v2686_v21  ;;  %3117 = vmatprep.subr.bf16.mxu1 %v2688_v28  ;;  %v2746_v21 = vld [vmem:[#allocation2 + $0x6c8] sm:$0xff]  ;;  %v2748_v28 = vld [vmem:[#allocation2 + $0x6d8] sm:$0xff] }
 0x556   :  { %2906 = vmatpush1.bf16.msra.mxu0 %v2685_v29  ;;  %3118 = vmatpush1.bf16.msra.mxu1 %v2687_v39  ;;  %v2747_v29 = vld [vmem:[#allocation2 + $0x6d0] sm:$0xff]  ;;  %v2750_v39 = vld [vmem:[#allocation2 + $0x6e8] sm:$0xff] }
 0x557   :  { %2907 = vmatprep.subr.bf16.mxu0 %v2690_v40  ;;  %3119 = vmatprep.subr.bf16.mxu1 %v2692_v41  ;;  %v2752_v40 = vld [vmem:[#allocation2 + $0x6f8] sm:$0xff]  ;;  %v2749_v41 = vld [vmem:[#allocation2 + $0x6e0] sm:$0xff] }
 0x55a   :  { %2908 = vmatpush1.bf16.msra.mxu0 %v2689_v42  ;;  %3120 = vmatpush1.bf16.msra.mxu1 %v2691_v43  ;;  %v2751_v42 = vld [vmem:[#allocation2 + $0x6f0] sm:$0xff]  ;;  %v2754_v43 = vld [vmem:[#allocation2 + $0x708] sm:$0xff] }
 0x55b   :  { %2909 = vmatprep.subr.bf16.mxu0 %v2694_v44  ;;  %3121 = vmatprep.subr.bf16.mxu1 %v2696_v45  ;;  %v2756_v44 = vld [vmem:[#allocation2 + $0x718] sm:$0xff]  ;;  %v2753_v45 = vld [vmem:[#allocation2 + $0x700] sm:$0xff] }
 0x55e   :  { %2910 = vmatpush1.bf16.msra.mxu0 %v2693_v46  ;;  %3122 = vmatpush1.bf16.msra.mxu1 %v2695_v47  ;;  %v2755_v46 = vld [vmem:[#allocation2 + $0x710] sm:$0xff]  ;;  %v2758_v47 = vld [vmem:[#allocation2 + $0x728] sm:$0xff] }
 0x55f   :  { %2911 = vmatprep.subr.bf16.mxu0 %v2698_v13  ;;  %3123 = vmatprep.subr.bf16.mxu1 %v2700_v33  ;;  %v2760_v13 = vld [vmem:[#allocation2 + $0x738] sm:$0xff]  ;;  %v2757_v33 = vld [vmem:[#allocation2 + $0x720] sm:$0xff] }
 0x562   :  { %2912 = vmatpush1.bf16.msra.mxu0 %v2697_v48  ;;  %3124 = vmatpush1.bf16.msra.mxu1 %v2699_v49  ;;  %v2759_v48 = vld [vmem:[#allocation2 + $0x730] sm:$0xff]  ;;  %v2762_v49 = vld [vmem:[#allocation2 + $0x748] sm:$0xff] }
 0x563   :  { %2913 = vmatprep.subr.bf16.mxu0 %v2702_v50  ;;  %3125 = vmatprep.subr.bf16.mxu1 %v2704_v51  ;;  %v2764_v50 = vld [vmem:[#allocation2 + $0x758] sm:$0xff]  ;;  %v2761_v51 = vld [vmem:[#allocation2 + $0x740] sm:$0xff] }
 0x566   :  { %2914 = vmatpush1.bf16.msra.mxu0 %v2701_v52  ;;  %3126 = vmatpush1.bf16.msra.mxu1 %v2703_v53  ;;  %v2763_v52 = vld [vmem:[#allocation2 + $0x750] sm:$0xff]  ;;  %v2766_v53 = vld [vmem:[#allocation2 + $0x768] sm:$0xff] }
 0x567   :  { %2915 = vmatprep.subr.bf16.mxu0 %v2706_v54  ;;  %3127 = vmatprep.subr.bf16.mxu1 %v2708_v55  ;;  %v2768_v54 = vld [vmem:[#allocation2 + $0x778] sm:$0xff]  ;;  %v2765_v55 = vld [vmem:[#allocation2 + $0x760] sm:$0xff] }
 0x56a   :  { %2916 = vmatpush1.bf16.msra.mxu0 %v2705_v56  ;;  %3128 = vmatpush1.bf16.msra.mxu1 %v2707_v57  ;;  %v2767_v56 = vld [vmem:[#allocation2 + $0x770] sm:$0xff]  ;;  %v2770_v57 = vld [vmem:[#allocation2 + $0x788] sm:$0xff] }
 0x56b   :  { %2917 = vmatprep.subr.bf16.mxu0 %v2710_v58  ;;  %3129 = vmatprep.subr.bf16.mxu1 %v2712_v59  ;;  %v2772_v58 = vld [vmem:[#allocation2 + $0x798] sm:$0xff]  ;;  %v2769_v59 = vld [vmem:[#allocation2 + $0x780] sm:$0xff] }
 0x56e   :  { %2918 = vmatpush1.bf16.msra.mxu0 %v2709_v60  ;;  %3130 = vmatpush1.bf16.msra.mxu1 %v2711_v61  ;;  %v2771_v60 = vld [vmem:[#allocation2 + $0x790] sm:$0xff]  ;;  %v2774_v61 = vld [vmem:[#allocation2 + $0x7a8] sm:$0xff] }
 0x56f   :  { %2919 = vmatprep.subr.bf16.mxu0 %v2714_v62  ;;  %3131 = vmatprep.subr.bf16.mxu1 %v2716_v63  ;;  %v2776_v62 = vld [vmem:[#allocation2 + $0x7b8] sm:$0xff]  ;;  %v2773_v63 = vld [vmem:[#allocation2 + $0x7a0] sm:$0xff] }
 0x572   :  { %2920 = vmatpush1.bf16.msra.mxu0 %v2713_v0  ;;  %3132 = vmatpush1.bf16.msra.mxu1 %v2715_v20  ;;  %v2775_v0 = vld [vmem:[#allocation2 + $0x7b0] sm:$0xff]  ;;  %v2778_v20 = vld [vmem:[#allocation2 + $0x7c8] sm:$0xff] }
 0x573   :  { %2921 = vmatprep.subr.bf16.mxu0 %v2718_v1  ;;  %3133 = vmatprep.subr.bf16.mxu1 %v2720_v2  ;;  %v2780_v1 = vld [vmem:[#allocation2 + $0x7d8] sm:$0xff]  ;;  %v2777_v2 = vld [vmem:[#allocation2 + $0x7c0] sm:$0xff] }
 0x576   :  { %2922 = vmatpush1.bf16.msra.mxu0 %v2717_v3  ;;  %3134 = vmatpush1.bf16.msra.mxu1 %v2719_v31  ;;  %v2779_v3 = vld [vmem:[#allocation2 + $0x7d0] sm:$0xff]  ;;  %v2782_v31 = vld [vmem:[#allocation2 + $0x7e8] sm:$0xff] }
 0x577   :  { %2944 = vmatprep.subr.bf16.mxu0 %v2722_v4  ;;  %3156 = vmatprep.subr.bf16.mxu1 %v2724_v5  ;;  %v2784_v4 = vld [vmem:[#allocation2 + $0x7f8] sm:$0xff]  ;;  %v2781_v5 = vld [vmem:[#allocation2 + $0x7e0] sm:$0xff] }
 0x579   :  { %2924 = vmatmul.mubr.bf16.vlgmr.msra.gmra.mrb[80].mxu0 %v4698_v24  ;;  %3136 = vmatmul.mubr.bf16.vlgmr.msra.gmra.mrb[32].mxu1 %v4698_v24  ;;  %v2736_v24 = vld [vmem:[#allocation2 + $0x678] sm:$0xff] }
 0x57a   :  { %2945 = vmatpush1.bf16.msra.mxu0 %v2721_v6  ;;  %3157 = vmatpush1.bf16.msra.mxu1 %v2723_v30  ;;  %v2783_v6 = vld [vmem:[#allocation2 + $0x7f0] sm:$0xff] }
 0x57b   :  { %2946 = vmatprep.subr.bf16.mxu0 %v2726_v7  ;;  %3158 = vmatprep.subr.bf16.mxu1 %v2728_v8 }
 0x57c   :  { %2933 = vmatprep.mubr.bf16.mxu0 %v4717_v36  ;;  %3145 = vmatprep.mubr.bf16.mxu1 %v4717_v36  ;;  %v2740_v36 = vld [vmem:[#allocation2 + $0x698] sm:$0xff] }
 0x57e   :  { %2947 = vmatpush1.bf16.msra.mxu0 %v2725_v22  ;;  %3159 = vmatpush1.bf16.msra.mxu1 %v2727_v9 }
 0x57f   :  { %2948 = vmatprep.subr.bf16.mxu0 %v2730_v10  ;;  %3160 = vmatprep.subr.bf16.mxu1 %v2732_v23 }
 0x581   :  { %2934 = vmatmul.mubr.bf16.gmra.mrb[84].mxu0 %v4715_v35  ;;  %3146 = vmatmul.mubr.bf16.gmra.mrb[36].mxu1 %v4715_v35  ;;  %v2744_v35 = vld [vmem:[#allocation2 + $0x6b8] sm:$0xff] }
 0x582   :  { %2949 = vmatpush1.bf16.msra.mxu0 %v2729_v34  ;;  %3161 = vmatpush1.bf16.msra.mxu1 %v2731_v11 }
 0x583   :  { %2950 = vmatprep.subr.bf16.mxu0 %v2734_v12  ;;  %3162 = vmatprep.subr.bf16.mxu1 %v2736_v24 }
 0x584   :  { %2976 = vmatprep.mubr.bf16.mxu0 %v4704_v27  ;;  %3188 = vmatprep.mubr.bf16.mxu1 %v4704_v27  ;;  %v2745_v27 = vld [vmem:[#allocation2 + $0x6c0] sm:$0xff] }
 0x586   :  { %2951 = vmatpush1.bf16.msra.mxu0 %v2733_v14  ;;  %3163 = vmatpush1.bf16.msra.mxu1 %v2735_v32 }
 0x587   :  { %2952 = vmatprep.subr.bf16.mxu0 %v2738_v15  ;;  %3164 = vmatprep.subr.bf16.mxu1 %v2740_v36  ;;  %v3272_v36 = vlaneseq }
 0x58a   :  { %2953 = vmatpush1.bf16.msra.mxu0 %v2737_v16  ;;  %3165 = vmatpush1.bf16.msra.mxu1 %v2739_v17 }
 0x58b   :  { %2954 = vmatprep.subr.bf16.mxu0 %v2742_v18  ;;  %3166 = vmatprep.subr.bf16.mxu1 %v2744_v35 }
 0x58e   :  { %2955 = vmatpush1.bf16.msra.mxu0 %v2741_v25  ;;  %3167 = vmatpush1.bf16.msra.mxu1 %v2743_v19 }
 0x58f   :  { %2956 = vmatprep.subr.bf16.mxu0 %v2746_v21  ;;  %3168 = vmatprep.subr.bf16.mxu1 %v2748_v28 }
 0x592   :  { %2957 = vmatpush1.bf16.msra.mxu0 %v2745_v27  ;;  %3169 = vmatpush1.bf16.msra.mxu1 %v2747_v29  ;;  %v4753_v29 = vshrl.u32 %v3272_v36, 7 }
 0x593   :  { %2958 = vmatprep.subr.bf16.mxu0 %v2750_v39  ;;  %3170 = vmatprep.subr.bf16.mxu1 %v2752_v40 }
 0x596   :  { %2959 = vmatpush1.bf16.msra.mxu0 %v2749_v41  ;;  %3171 = vmatpush1.bf16.msra.mxu1 %v2751_v42 }
 0x597   :  { %2960 = vmatprep.subr.bf16.mxu0 %v2754_v43  ;;  %3172 = vmatprep.subr.bf16.mxu1 %v2756_v44 }
 0x59a   :  { %2961 = vmatpush1.bf16.msra.mxu0 %v2753_v45  ;;  %3173 = vmatpush1.bf16.msra.mxu1 %v2755_v46 }
 0x59b   :  { %2962 = vmatprep.subr.bf16.mxu0 %v2758_v47  ;;  %3174 = vmatprep.subr.bf16.mxu1 %v2760_v13 }
 0x59e   :  { %2963 = vmatpush1.bf16.msra.mxu0 %v2757_v33  ;;  %3175 = vmatpush1.bf16.msra.mxu1 %v2759_v48 }
 0x59f   :  { %2964 = vmatprep.subr.bf16.mxu0 %v2762_v49  ;;  %3176 = vmatprep.subr.bf16.mxu1 %v2764_v50 }
 0x5a2   :  { %2965 = vmatpush1.bf16.msra.mxu0 %v2761_v51  ;;  %3177 = vmatpush1.bf16.msra.mxu1 %v2763_v52  ;;  %v3274_v51 = vsub.s32 0, %v4753_v29 }
 0x5a3   :  { %2966 = vmatprep.subr.bf16.mxu0 %v2766_v53  ;;  %3178 = vmatprep.subr.bf16.mxu1 %v2768_v54 }
 0x5a6   :  { %2967 = vmatpush1.bf16.msra.mxu0 %v2765_v55  ;;  %3179 = vmatpush1.bf16.msra.mxu1 %v2767_v56 }
 0x5a7   :  { %2968 = vmatprep.subr.bf16.mxu0 %v2770_v57  ;;  %3180 = vmatprep.subr.bf16.mxu1 %v2772_v58 }
 0x5aa   :  { %2969 = vmatpush1.bf16.msra.mxu0 %v2769_v59  ;;  %3181 = vmatpush1.bf16.msra.mxu1 %v2771_v60 }
 0x5ab   :  { %2970 = vmatprep.subr.bf16.mxu0 %v2774_v61  ;;  %3182 = vmatprep.subr.bf16.mxu1 %v2776_v62  ;;  %v3278_v62 = vsub.s32 1, %v4753_v29 }
 0x5ae   :  { %2971 = vmatpush1.bf16.msra.mxu0 %v2773_v63  ;;  %3183 = vmatpush1.bf16.msra.mxu1 %v2775_v0  ;;  %v3282_v63 = vsub.s32 2, %v4753_v29 }
 0x5af   :  { %2972 = vmatprep.subr.bf16.mxu0 %v2778_v20  ;;  %3184 = vmatprep.subr.bf16.mxu1 %v2780_v1  ;;  %v3270_v1 = vld [vmem:[%s4780_s8] sm:$0xf] }
 0x5b2   :  { %2973 = vmatpush1.bf16.msra.mxu0 %v2777_v2  ;;  %3185 = vmatpush1.bf16.msra.mxu1 %v2779_v3  ;;  %v3286_v2 = vsub.s32 3, %v4753_v29 }
 0x5b3   :  { %2974 = vmatprep.subr.bf16.mxu0 %v2782_v31  ;;  %3186 = vmatprep.subr.bf16.mxu1 %v2784_v4 }
 0x5b6   :  { %2975 = vmatpush1.bf16.msra.mxu0 %v2781_v5  ;;  %3187 = vmatpush1.bf16.msra.mxu1 %v2783_v6 }
 0x5b9   :  { %2977 = vmatmul.mubr.bf16.vlgmr.msra.gmra.mrb[80].mxu0 %v4702_v26  ;;  %3189 = vmatmul.mubr.bf16.vlgmr.msra.gmra.mrb[32].mxu1 %v4702_v26 }
 0x5ba   :  { %2986 = vmatprep.mubr.bf16.mxu0 %v4721_v38  ;;  %3198 = vmatprep.mubr.bf16.mxu1 %v4721_v38 }
 0x5c1   :  { %2987 = vmatmul.mubr.bf16.gmra.mrb[84].mxu0 %v4719_v37  ;;  %3199 = vmatmul.mubr.bf16.gmra.mrb[36].mxu1 %v4719_v37 }
 0x68c   :  { %v2978_v30 = vpop.f32.mrb[80].mxu0  ;;  %v3190_v7 = vpop.f32.mrb[32].mxu1 }
 0x68d   :  { %v2980_v8 = vpop.f32.mrb[81].mxu0  ;;  %v3192_v22 = vpop.f32.mrb[33].mxu1 }
 0x68e   :  { %v2982_v9 = vpop.f32.mrb[82].mxu0  ;;  %v3194_v10 = vpop.f32.mrb[34].mxu1 }
 0x68f   :  { %v3209_v23 = vadd.f32 %v2982_v9, %v2978_v30  ;;  %v3223_v34 = vadd.f32 %v3194_v10, %v3190_v7  ;;  %v2984_v11 = vpop.f32.mrb[83].mxu0  ;;  %v3196_v12 = vpop.f32.mrb[35].mxu1  ;;  %v3275_v10 = vrot.slane %v3270_v1, %v3274_v51 }
 0x690   :  { %v3216_v24 = vadd.f32 %v2984_v11, %v2980_v8  ;;  %v3230_v26 = vadd.f32 %v3196_v12, %v3192_v22  ;;  %v3279_v12 = vrot.slane %v3270_v1, %v3278_v62 }
 0x691   :  { %v3210_v14 = vrot.slane %v3209_v23, 4  ;;  %v3224_v32 = vrot.slane %v3223_v34, 4 }
 0x692   :  { %v3217_v15 = vrot.slane %v3216_v24, 4  ;;  %v3231_v38 = vrot.slane %v3230_v26, 4 }
 0x693   :  { %v3211_v16 = vadd.f32 %v3210_v14, %v3209_v23  ;;  %v3225_v17 = vadd.f32 %v3224_v32, %v3223_v34  ;;  %v3283_v23 = vrot.slane %v3270_v1, %v3282_v63 }
 0x694   :  { %v3218_v37 = vadd.f32 %v3217_v15, %v3216_v24  ;;  %v3232_v18 = vadd.f32 %v3231_v38, %v3230_v26  ;;  %v2988_v35 = vpop.f32.mrb[84].mxu0  ;;  %v3200_v25 = vpop.f32.mrb[36].mxu1  ;;  %v3287_v24 = vrot.slane %v3270_v1, %v3286_v2  ;;  %v3300_v26 = vld [vmem:[%s4781_s9] sm:$0xf] }
 0x695   :  { %v2990_v19 = vpop.f32.mrb[85].mxu0  ;;  %v3202_v21 = vpop.f32.mrb[37].mxu1  ;;  %v3212_v39 = vrot.slane %v3211_v16, 2  ;;  %v3226_v40 = vrot.slane %v3225_v17, 2 }
 0x696   :  { %v2992_v28 = vpop.f32.mrb[86].mxu0  ;;  %v3204_v27 = vpop.f32.mrb[38].mxu1  ;;  %v3219_v45 = vrot.slane %v3218_v37, 2  ;;  %v3233_v46 = vrot.slane %v3232_v18, 2 }
 0x697   :  { %v3237_v41 = vadd.f32 %v2992_v28, %v2988_v35  ;;  %v3251_v42 = vadd.f32 %v3204_v27, %v3200_v25  ;;  %v2994_v43 = vpop.f32.mrb[87].mxu0  ;;  %v3206_v44 = vpop.f32.mrb[39].mxu1  ;;  %v3213_v52 = vadd.f32 %v3212_v39, %v3211_v16  ;;  %v3227_v53 = vadd.f32 %v3226_v40, %v3225_v17 }
 0x698   :  { %v3244_v47 = vadd.f32 %v2994_v43, %v2990_v19  ;;  %v3258_v13 = vadd.f32 %v3206_v44, %v3202_v21  ;;  %v3220_v56 = vadd.f32 %v3219_v45, %v3218_v37  ;;  %v3234_v57 = vadd.f32 %v3233_v46, %v3232_v18 }
 0x699   :  { %v3238_v33 = vrot.slane %v3237_v41, 4  ;;  %v3252_v48 = vrot.slane %v3251_v42, 4  ;;  %v3214_v3 = vrot.slane %v3213_v52, 1  ;;  %v3228_v31 = vrot.slane %v3227_v53, 1 }
 0x69a   :  { %v3245_v49 = vrot.slane %v3244_v47, 4  ;;  %v3259_v50 = vrot.slane %v3258_v13, 4  ;;  %v3221_v6 = vrot.slane %v3220_v56, 1  ;;  %v3235_v30 = vrot.slane %v3234_v57, 1 }
 0x69b   :  { %v3239_v54 = vadd.f32 %v3238_v33, %v3237_v41  ;;  %v3253_v55 = vadd.f32 %v3252_v48, %v3251_v42  ;;  %v3215_v14 = vadd.f32 %v3214_v3, %v3213_v52  ;;  %v3229_v32 = vadd.f32 %v3228_v31, %v3227_v53 }
 0x69c   :  { %v3246_v58 = vadd.f32 %v3245_v49, %v3244_v47  ;;  %v3260_v59 = vadd.f32 %v3259_v50, %v3258_v13  ;;  %v3222_v36 = vadd.f32 %v3221_v6, %v3220_v56  ;;  %v3236_v16 = vadd.f32 %v3235_v30, %v3234_v57  ;;  %v3555_v56 = vld [vmem:[#allocation4] ss:$0 sm:$0xff] }
 0x69d   :  { %v3240_v60 = vrot.slane %v3239_v54, 2  ;;  %v3254_v61 = vrot.slane %v3253_v55, 2  ;;  %v3305_v25 = vrot.slane %v3300_v26, %v3274_v51  ;;  %v3309_v40 = vrot.slane %v3300_v26, %v3278_v62 }
 0x69e   :  { %v3247_v0 = vrot.slane %v3246_v58, 2  ;;  %v3261_v20 = vrot.slane %v3260_v59, 2  ;;  %v3313_v41 = vrot.slane %v3300_v26, %v3282_v63  ;;  %v3317_v46 = vrot.slane %v3300_v26, %v3286_v2 }
 0x69f   :  { %v3241_v4 = vadd.f32 %v3240_v60, %v3239_v54  ;;  %v3255_v5 = vadd.f32 %v3254_v61, %v3253_v55 }
 0x6a0   :  { %v3248_v7 = vadd.f32 %v3247_v0, %v3246_v58  ;;  %v3262_v8 = vadd.f32 %v3261_v20, %v3260_v59 }
 0x6a1   :  { %v3242_v22 = vrot.slane %v3241_v4, 1  ;;  %v3256_v9 = vrot.slane %v3255_v5, 1 }
 0x6a2   :  { %v3249_v34 = vrot.slane %v3248_v7, 1  ;;  %v3263_v11 = vrot.slane %v3262_v8, 1 }
 0x6a3   :  { %v3243_v15 = vadd.f32 %v3242_v22, %v3241_v4  ;;  %v3257_v38 = vadd.f32 %v3256_v9, %v3255_v5 }
 0x6a4   :  { %v3250_v17 = vadd.f32 %v3249_v34, %v3248_v7  ;;  %v3264_v37 = vadd.f32 %v3263_v11, %v3262_v8 }
 0x6a5   :  { %v3266_v18 = vsel %vm3265_vm3, %v3215_v14, %v3243_v15  ;;  %v3268_v35 = vsel %vm3265_vm3, %v3229_v32, %v3257_v38 }
 0x6a6   :  { %v3267_v19 = vsel %vm3265_vm3, %v3222_v36, %v3250_v17  ;;  %v3269_v21 = vsel %vm3265_vm3, %v3236_v16, %v3264_v37  ;;  %v3292_v28 = vadd.f32 %v3275_v10, %v3266_v18  ;;  %v3294_v27 = vadd.f32 %v3283_v23, %v3268_v35 }
 0x6a7   :  { %v3293_v29 = vadd.f32 %v3279_v12, %v3267_v19  ;;  %v3295_v39 = vadd.f32 %v3287_v24, %v3269_v21 }
 0x6a8   :  { %v3296_v42 = vmax.f32 %v3292_v28, 0.0  ;;  %v3298_v43 = vmax.f32 %v3294_v27, 0.0 }
 0x6a9   :  { %v3297_v44 = vmax.f32 %v3293_v29, 0.0  ;;  %v3299_v45 = vmax.f32 %v3295_v39, 0.0 }
 0x6aa   :  { %v3322_v47 = vmul.f32 %v3305_v25, %v3296_v42  ;;  %v3324_v33 = vmul.f32 %v3313_v41, %v3298_v43 }
 0x6ab   :  { %v3323_v13 = vmul.f32 %v3309_v40, %v3297_v44  ;;  %v3325_v49 = vmul.f32 %v3317_v46, %v3299_v45 }
 0x6ac   :  { %v3327_v48 = vsel %vm3326_vm4, %v3322_v47, 0.0  ;;  %v3330_v52 = vsel %vm3326_vm4, %v3324_v33, 0.0 }
 0x6ad   :  { %v3328_v50 = vsel %vm3326_vm4, %v3323_v13, 0.0  ;;  %v3332_v54 = vsel %vm3326_vm4, %v3325_v49, 0.0 }
 0x6ae   :  { %v3329_v51 = vadd.f32 %v3328_v50, %v3327_v48 }
 0x6b0   :  { %v3331_v53 = vadd.f32 %v3330_v52, %v3329_v51 }
 0x6b2   :  { %v3333_v55 = vadd.f32 %v3332_v54, %v3331_v53 }
 0x6b4   :  { %3334 = vadd.xlane.f32.xlu0 %v3333_v55 }
 0x741   :  { %v3335_v57 = vpop.xlane.xlu0 %3334 }
 0x742   :  { %v3343_v58 = vadd.f32 %v3555_v56, %v3335_v57 }
 0x744   :  { %3345 = vst.msk [vmem:[%s4783_s11] sm:$0x3] %vm3344_vm5, %v3343_v58 }
 0x745   :  { %3350 = vsyncmov [#allocation3] }
 0x748   :  { %s3351_s2 = vpop.sfrf %3350 }
 0x749   :  { %p3556_p0 = scmp.ne.s32.totalorder %s3351_s2, 0 }
 0x74b   :  { %3355 = shalt.err (%p3556_p0)  }

</bundles_post_ra>
